<compile_context>
chip_gen: v7x
topology: tpu7x:2x2x1
jax: 0.10.0
libtpu: 0.0.40
codegen_flags: <defaults>
</compile_context>

<pallas_src>
import math
import functools

import jax
import jax.numpy as jnp
import numpy as np
from jax.experimental import pallas as pl
from jax.experimental.pallas import tpu as pltpu


# ----------------------------- Pallas kernel ------------------------------ #
def _encoder_stack_kernel(nhead, seq_len, ffn_chunk, with_attn,
                          x_ref, pm_ref, wqkv_ref, wo_ref, w1_ref, w2_ref, vec_ref,
                          y_ref, *rest):
    """One grid step == (batch tile b, layer l); y_ref is the resident activation."""
    if with_attn:
        attn_ref, o_scratch = rest
    else:
        (o_scratch,) = rest

    l = pl.program_id(1)                       # layer axis (innermost, sequential)
    R, D = x_ref.shape                         # R = batch_tile * seq_len
    S = seq_len
    TB = R // S
    H = nhead
    dh = D // H
    dff = w1_ref.shape[2]

    # Layer 0 of this batch tile: seed the resident activation with the input.
    @pl.when(l == 0)
    def _():
        y_ref[...] = x_ref[...]

    # q = k = value = residual base = (prev_output + pos + mod)   [f32]
    xp = y_ref[...] + pm_ref[...]                                   # (R, D)

    # Packed per-layer vectors: rows = [bqkv, bo, b1, b2, g1, beta1, g2, beta2]
    vec = vec_ref[0]                                                # (8, W) f32
    bqkv = vec[0:1, 0:3 * D]
    bo = vec[1:2, 0:D]
    b2 = vec[3:4, 0:D]
    g1 = vec[4:5, 0:D]
    beta1 = vec[5:6, 0:D]
    g2 = vec[6:7, 0:D]
    beta2 = vec[7:8, 0:D]

    # ---- fused QKV projection: bf16 MXU operands, f32 accumulation ----
    # (1/sqrt(dh) is pre-folded into the Q columns of wqkv / bqkv on the host.)
    qkv = jnp.dot(xp.astype(jnp.bfloat16), wqkv_ref[0],
                  preferred_element_type=jnp.float32) + bqkv        # (R, 3D) f32

    # ---- batched multi-head attention (heads folded into the leading batch dim) ----
    # TODO(synk): attn_mask / key_padding_mask not implemented (callers pass None).
    qkv3 = qkv.reshape(TB, S, 3 * D)
    qkv_bf = qkv3.astype(jnp.bfloat16)
    q_h = jnp.concatenate([qkv_bf[:, :, h * dh:(h + 1) * dh]
                           for h in range(H)], axis=0)              # (H*TB, S, dh)
    k_h = jnp.concatenate([qkv_bf[:, :, D + h * dh:D + (h + 1) * dh]
                           for h in range(H)], axis=0)
    v_h = jnp.concatenate([qkv_bf[:, :, 2 * D + h * dh:2 * D + (h + 1) * dh]
                           for h in range(H)], axis=0)

    s = jnp.einsum('nqd,nkd->nqk', q_h, k_h,
                   preferred_element_type=jnp.float32)              # (H*TB, S, S) f32
    s = s - jnp.max(s, axis=-1, keepdims=True)
    e = jnp.exp(s)
    p = e * pl.reciprocal(jnp.sum(e, axis=-1, keepdims=True), approx=False)

    if with_attn:
        # head-averaged attention map, written lane-dense as (R, S)
        attn_ref[0] = jnp.mean(p.reshape(H, R, S), axis=0)

    o = jnp.einsum('nqk,nkd->nqd', p.astype(jnp.bfloat16), v_h,
                   preferred_element_type=jnp.float32)              # (H*TB, S, dh) f32

    # de-interleave heads back into (R, D) via static lane offsets into a VMEM scratch
    for h in range(H):
        o_scratch[:, h * dh:(h + 1) * dh] = o[h * TB:(h + 1) * TB].reshape(R, dh)

    src2 = jnp.dot(o_scratch[...].astype(jnp.bfloat16), wo_ref[0],
                   preferred_element_type=jnp.float32) + bo         # (R, D)

    # ---- residual + LayerNorm1 (f32) ----
    h1 = xp + src2
    mu1 = jnp.mean(h1, axis=-1, keepdims=True)
    var1 = jnp.mean((h1 - mu1) ** 2, axis=-1, keepdims=True)
    h1n = (h1 - mu1) * jax.lax.rsqrt(var1 + 1e-5) * g1 + beta1

    # ---- feed-forward (relu), chunked over dff to bound the intermediate ----
    h1n_bf = h1n.astype(jnp.bfloat16)
    f2 = jnp.zeros((R, D), jnp.float32)
    for c0 in range(0, dff, ffn_chunk):
        c1 = c0 + ffn_chunk
        fc = jnp.maximum(
            jnp.dot(h1n_bf, w1_ref[0, :, c0:c1],
                    preferred_element_type=jnp.float32) + vec[2:3, c0:c1], 0.0)
        f2 = f2 + jnp.dot(fc.astype(jnp.bfloat16), w2_ref[0, c0:c1, :],
                          preferred_element_type=jnp.float32)
    f2 = f2 + b2

    # ---- residual + LayerNorm2 (f32) ----
    h2 = h1n + f2
    mu2 = jnp.mean(h2, axis=-1, keepdims=True)
    var2 = jnp.mean((h2 - mu2) ** 2, axis=-1, keepdims=True)
    y_ref[...] = (h2 - mu2) * jax.lax.rsqrt(var2 + 1e-5) * g2 + beta2


# ------------------------------ JAX wrapper -------------------------------- #
def transformer_encoder_forward(src, params_list, nhead, src_pos=None, src_mod=None,
                                return_attn_maps=True, batch_tile=1, ffn_chunk=512):
    """Equivalent of Transformer_Encoder.forward (normalize_before=False)."""
    B, S, D = src.shape
    L = len(params_list)
    dff = params_list[0]['w1'].shape[0]
    dh = D // nhead

    if src_pos is None:
        src_pos = jnp.zeros_like(src)
    if src_mod is None:
        src_mod = jnp.zeros_like(src)

    tb = batch_tile if (batch_tile and B % batch_tile == 0) else 1
    chunk = min(ffn_chunk, dff)
    if dff % chunk != 0:
        chunk = dff

    # Fold batch into rows; precompute (pos + mod) once.
    x2 = src.reshape(B * S, D).astype(jnp.float32)
    pm2 = (src_pos + src_mod).reshape(B * S, D).astype(jnp.float32)

    # Host weight prep: fold 1/sqrt(dh) into Q, pre-transpose, cast MXU operands to bf16.
    q_scale = 1.0 / math.sqrt(dh)

    def prep(p):
        wqkv = jnp.concatenate([p['wqkv'][:D] * q_scale, p['wqkv'][D:]], axis=0)
        bqkv = jnp.concatenate([p['bqkv'][:, :D] * q_scale, p['bqkv'][:, D:]], axis=1)
        return wqkv.T, bqkv

    preps = [prep(p) for p in params_list]
    wqkv_t = jnp.stack([w for w, _ in preps]).astype(jnp.bfloat16)                # (L, D, 3D)
    wo_t = jnp.stack([p['wo'].T for p in params_list]).astype(jnp.bfloat16)       # (L, D, D)
    w1_t = jnp.stack([p['w1'].T for p in params_list]).astype(jnp.bfloat16)       # (L, D, dff)
    w2_t = jnp.stack([p['w2'].T for p in params_list]).astype(jnp.bfloat16)       # (L, dff, D)

    # Pack the 8 small f32 vectors per layer into one (L, 8, W) buffer (one DMA / layer).
    W = max(3 * D, dff, D)

    def row(v):
        v = v.reshape(1, -1).astype(jnp.float32)
        return jnp.pad(v, ((0, 0), (0, W - v.shape[1])))

    vecs = jnp.stack([
        jnp.concatenate([row(bq), row(p['bo']), row(p['b1']), row(p['b2']),
                         row(p['g1']), row(p['beta1']), row(p['g2']), row(p['beta2'])],
                        axis=0)
        for (_, bq), p in zip(preps, params_list)])                               # (L, 8, W)

    kernel = functools.partial(_encoder_stack_kernel, nhead, S, chunk, return_attn_maps)

    R = tb * S
    out_specs = [pl.BlockSpec((R, D), lambda b, l: (b, 0))]                       # resident act
    out_shapes = [jax.ShapeDtypeStruct((B * S, D), jnp.float32)]
    if return_attn_maps:
        out_specs.append(pl.BlockSpec((1, R, S), lambda b, l: (l, b, 0)))         # attn maps
        out_shapes.append(jax.ShapeDtypeStruct((L, B * S, S), jnp.float32))

    results = pl.pallas_call(
        kernel,
        grid=(B // tb, L),
        in_specs=[
            pl.BlockSpec((R, D), lambda b, l: (b, 0)),            # x (seeds layer 0)
            pl.BlockSpec((R, D), lambda b, l: (b, 0)),            # pos + mod
            pl.BlockSpec((1, D, 3 * D), lambda b, l: (l, 0, 0)),  # wqkv^T (bf16, q-scale folded)
            pl.BlockSpec((1, D, D), lambda b, l: (l, 0, 0)),      # wo^T   (bf16)
            pl.BlockSpec((1, D, dff), lambda b, l: (l, 0, 0)),    # w1^T   (bf16)
            pl.BlockSpec((1, dff, D), lambda b, l: (l, 0, 0)),    # w2^T   (bf16)
            pl.BlockSpec((1, 8, W), lambda b, l: (l, 0, 0)),      # packed biases / LN params
        ],
        out_specs=tuple(out_specs),
        out_shape=tuple(out_shapes),
        scratch_shapes=[pltpu.VMEM((R, D), jnp.float32)],         # head-recombination scratch
        compiler_params=pltpu.CompilerParams(
            dimension_semantics=("parallel", "arbitrary"),        # batch tiles || , layers seq
            vmem_limit_bytes=64 * 1024 * 1024),
    )(x2, pm2, wqkv_t, wo_t, w1_t, w2_t, vecs)

    memory = results[0].reshape(B, S, D)
    if return_attn_maps:
        attn = results[1].reshape(L, B, S, S)
        return memory, [attn[i] for i in range(L)]
    return memory, None


# -------------------------- deterministic params --------------------------- #
def init_layer_params(key, d_model, dff):
    ks = jax.random.split(key, 4)
    s = 0.02
    return dict(
        wqkv=s * jax.random.normal(ks[0], (3 * d_model, d_model), jnp.float32),
        bqkv=jnp.zeros((1, 3 * d_model), jnp.float32),
        wo=s * jax.random.normal(ks[1], (d_model, d_model), jnp.float32),
        bo=jnp.zeros((1, d_model), jnp.float32),
        w1=s * jax.random.normal(ks[2], (dff, d_model), jnp.float32),
        b1=jnp.zeros((1, dff), jnp.float32),
        w2=s * jax.random.normal(ks[3], (d_model, dff), jnp.float32),
        b2=jnp.zeros((1, d_model), jnp.float32),
        g1=jnp.ones((1, d_model), jnp.float32),
        beta1=jnp.zeros((1, d_model), jnp.float32),
        g2=jnp.ones((1, d_model), jnp.float32),
        beta2=jnp.zeros((1, d_model), jnp.float32),
    )


# ------------------------------- pure-JAX ref ------------------------------ #
def _ref_layer(x, pos, mod, p, nhead):
    B, S, D = x.shape
    H, dh = nhead, D // nhead
    xp = x + pos + mod
    wqkv, bqkv = p['wqkv'], p['bqkv'][0]
    q = xp @ wqkv[:D].T + bqkv[:D]
    k = xp @ wqkv[D:2 * D].T + bqkv[D:2 * D]
    v = xp @ wqkv[2 * D:].T + bqkv[2 * D:]
    qh = q.reshape(B, S, H, dh).transpose(0, 2, 1, 3)
    kh = k.reshape(B, S, H, dh).transpose(0, 2, 1, 3)
    vh = v.reshape(B, S, H, dh).transpose(0, 2, 1, 3)
    sc = jnp.einsum('bhqd,bhkd->bhqk', qh / math.sqrt(dh), kh)
    pw = jax.nn.softmax(sc, axis=-1)
    o = jnp.einsum('bhqk,bhkd->bhqd', pw, vh).transpose(0, 2, 1, 3).reshape(B, S, D)
    src2 = o @ p['wo'].T + p['bo'][0]
    h1 = xp + src2
    h1n = (h1 - h1.mean(-1, keepdims=True)) * jax.lax.rsqrt(h1.var(-1, keepdims=True) + 1e-5)
    h1n = h1n * p['g1'][0] + p['beta1'][0]
    f = jnp.maximum(h1n @ p['w1'].T + p['b1'][0], 0.0) @ p['w2'].T + p['b2'][0]
    h2 = h1n + f
    h2n = (h2 - h2.mean(-1, keepdims=True)) * jax.lax.rsqrt(h2.var(-1, keepdims=True) + 1e-5)
    return h2n * p['g2'][0] + p['beta2'][0], pw.mean(axis=1)


# ---------------------------------- main ----------------------------------- #
if __name__ == "__main__":
    B, S = 2, 8
    d_model, nhead, num_layers, dff = 32, 4, 2, 64

    key = jax.random.PRNGKey(0)
    k_src, k_pos, k_mod, k_par = jax.random.split(key, 4)
    src = jax.random.normal(k_src, (B, S, d_model), jnp.float32)
    src_pos = 0.1 * jax.random.normal(k_pos, (B, S, d_model), jnp.float32)
    src_mod = 0.1 * jax.random.normal(k_mod, (B, S, d_model), jnp.float32)

    params_list = [init_layer_params(jax.random.fold_in(k_par, i), d_model, dff)
                   for i in range(num_layers)]

    memory, attn_maps = transformer_encoder_forward(
        src, params_list, nhead, src_pos=src_pos, src_mod=src_mod,
        return_attn_maps=True, batch_tile=1)
    memory = jax.block_until_ready(memory)
    attn_maps = [jax.block_until_ready(a) for a in attn_maps]

    # pure-JAX f32 reference (kernel uses bf16 MXU operands -> looser tolerance)
    ref = src
    ref_attns = []
    for p in params_list:
        ref, a = _ref_layer(ref, src_pos, src_mod, p, nhead)
        ref_attns.append(a)
    np.testing.assert_allclose(np.asarray(memory), np.asarray(ref), atol=2e-2, rtol=2e-2)
    for a_k, a_r in zip(attn_maps, ref_attns):
        np.testing.assert_allclose(np.asarray(a_k), np.asarray(a_r), atol=2e-2, rtol=2e-2)

    # attention-map-free variant (feedback: make the attn output optional)
    mem2, _ = transformer_encoder_forward(
        src, params_list, nhead, src_pos=src_pos, src_mod=src_mod,
        return_attn_maps=False, batch_tile=1)
    mem2 = jax.block_until_ready(mem2)
    np.testing.assert_allclose(np.asarray(mem2), np.asarray(memory), atol=2e-2, rtol=2e-2)

    print("KERNEL_OK")
</pallas_src>

<mosaic_0001>
module attributes {stable_mosaic.version = 11 : i64} {
  func.func @_encoder_stack_kernel(%arg0: i32, %arg1: i32, %arg2: memref<8x32xf32, #tpu.memory_space<vmem>>, %arg3: memref<8x32xf32, #tpu.memory_space<vmem>>, %arg4: memref<1x32x96xbf16, #tpu.memory_space<vmem>>, %arg5: memref<1x32x32xbf16, #tpu.memory_space<vmem>>, %arg6: memref<1x32x64xbf16, #tpu.memory_space<vmem>>, %arg7: memref<1x64x32xbf16, #tpu.memory_space<vmem>>, %arg8: memref<1x8x96xf32, #tpu.memory_space<vmem>>, %arg9: memref<8x32xf32, #tpu.memory_space<vmem>>, %arg10: memref<1x8x8xf32, #tpu.memory_space<vmem>>, %arg11: memref<8x32xf32, #tpu.memory_space<vmem>>) attributes {dimension_semantics = [#tpu.dimension_semantics<parallel>, #tpu.dimension_semantics<arbitrary>], iteration_bounds = array<i64: 2, 2>, scalar_prefetch = 0 : i64, scratch_operands = 1 : i64, tpu.core_type = #tpu.core_type<tc>, window_params = [{transform_indices = @transform_0, window_bounds = array<i64: 8, 32>}, {transform_indices = @transform_1, window_bounds = array<i64: 8, 32>}, {transform_indices = @transform_2, window_bounds = array<i64: 1, 32, 96>}, {transform_indices = @transform_3, window_bounds = array<i64: 1, 32, 32>}, {transform_indices = @transform_4, window_bounds = array<i64: 1, 32, 64>}, {transform_indices = @transform_5, window_bounds = array<i64: 1, 64, 32>}, {transform_indices = @transform_6, window_bounds = array<i64: 1, 8, 96>}, {transform_indices = @transform_7, window_bounds = array<i64: 8, 32>}, {transform_indices = @transform_8, window_bounds = array<i64: 1, 8, 8>}]} {
    %c0_i32 = arith.constant 0 : i32
    %0 = arith.cmpi eq, %arg1, %c0_i32 : i32
    %1 = arith.extui %0 : i1 to i32
    %c0_i32_0 = arith.constant 0 : i32
    %2 = arith.cmpi ne, %1, %c0_i32_0 : i32
    scf.if %2 {
      %c0_52 = arith.constant 0 : index
      %c0_53 = arith.constant 0 : index
      %140 = vector.load %arg2[%c0_52, %c0_53] : memref<8x32xf32, #tpu.memory_space<vmem>>, vector<8x32xf32>
      %c0_54 = arith.constant 0 : index
      %c0_55 = arith.constant 0 : index
      %141 = vector.load %arg9[%c0_54, %c0_55] : memref<8x32xf32, #tpu.memory_space<vmem>>, vector<8x32xf32>
      tpu.vector_store %arg9[%c0_54, %c0_55], %140 {strides = array<i32>} : memref<8x32xf32, #tpu.memory_space<vmem>>, vector<8x32xf32>,
    } else {
    }
    %c0 = arith.constant 0 : index
    %c0_1 = arith.constant 0 : index
    %3 = vector.load %arg9[%c0, %c0_1] : memref<8x32xf32, #tpu.memory_space<vmem>>, vector<8x32xf32>
    %c0_2 = arith.constant 0 : index
    %c0_3 = arith.constant 0 : index
    %4 = vector.load %arg3[%c0_2, %c0_3] : memref<8x32xf32, #tpu.memory_space<vmem>>, vector<8x32xf32>
    %5 = arith.addf %3, %4 : vector<8x32xf32>
    %c0_4 = arith.constant 0 : index
    %c0_5 = arith.constant 0 : index
    %c0_6 = arith.constant 0 : index
    %6 = vector.load %arg8[%c0_4, %c0_5, %c0_6] : memref<1x8x96xf32, #tpu.memory_space<vmem>>, vector<1x8x96xf32>
    %7 = vector.shape_cast %6 : vector<1x8x96xf32> to vector<8x96xf32>
    %8 = vector.extract_strided_slice %7 {offsets = [0, 0], sizes = [1, 96], strides = [1, 1]} : vector<8x96xf32> to vector<1x96xf32>
    %9 = vector.extract_strided_slice %7 {offsets = [1, 0], sizes = [1, 32], strides = [1, 1]} : vector<8x96xf32> to vector<1x32xf32>
    %10 = vector.extract_strided_slice %7 {offsets = [3, 0], sizes = [1, 32], strides = [1, 1]} : vector<8x96xf32> to vector<1x32xf32>
    %11 = vector.extract_strided_slice %7 {offsets = [4, 0], sizes = [1, 32], strides = [1, 1]} : vector<8x96xf32> to vector<1x32xf32>
    %12 = vector.extract_strided_slice %7 {offsets = [5, 0], sizes = [1, 32], strides = [1, 1]} : vector<8x96xf32> to vector<1x32xf32>
    %13 = vector.extract_strided_slice %7 {offsets = [6, 0], sizes = [1, 32], strides = [1, 1]} : vector<8x96xf32> to vector<1x32xf32>
    %14 = vector.extract_strided_slice %7 {offsets = [7, 0], sizes = [1, 32], strides = [1, 1]} : vector<8x96xf32> to vector<1x32xf32>
    %15 = arith.truncf %5 : vector<8x32xf32> to vector<8x32xbf16>
    %c0_7 = arith.constant 0 : index
    %c0_8 = arith.constant 0 : index
    %c0_9 = arith.constant 0 : index
    %16 = vector.load %arg4[%c0_7, %c0_8, %c0_9] : memref<1x32x96xbf16, #tpu.memory_space<vmem>>, vector<1x32x96xbf16>
    %17 = vector.shape_cast %16 : vector<1x32x96xbf16> to vector<32x96xbf16>
    %cst = arith.constant dense<0.000000e+00> : vector<8x96xf32>
    %18 = tpu.matmul %15, %17, %cst {dimension_numbers = #tpu.dot_dimension_numbers<[1], [0], [0], [1], [0, 0, 1, 1], [], []>} : vector<8x32xbf16>, vector<32x96xbf16>, vector<8x96xf32> -> vector<8x96xf32>
    %19 = vector.broadcast %8 : vector<1x96xf32> to vector<8x96xf32>
    %20 = arith.addf %18, %19 : vector<8x96xf32>
    %21 = vector.shape_cast %20 : vector<8x96xf32> to vector<1x8x96xf32>
    %22 = arith.truncf %21 : vector<1x8x96xf32> to vector<1x8x96xbf16>
    %23 = vector.extract_strided_slice %22 {offsets = [0, 0, 0], sizes = [1, 8, 8], strides = [1, 1, 1]} : vector<1x8x96xbf16> to vector<1x8x8xbf16>
    %24 = vector.extract_strided_slice %22 {offsets = [0, 0, 8], sizes = [1, 8, 8], strides = [1, 1, 1]} : vector<1x8x96xbf16> to vector<1x8x8xbf16>
    %25 = vector.extract_strided_slice %22 {offsets = [0, 0, 16], sizes = [1, 8, 8], strides = [1, 1, 1]} : vector<1x8x96xbf16> to vector<1x8x8xbf16>
    %26 = vector.extract_strided_slice %22 {offsets = [0, 0, 24], sizes = [1, 8, 8], strides = [1, 1, 1]} : vector<1x8x96xbf16> to vector<1x8x8xbf16>
    %27 = tpu.concatenate %23, %24, %25, %26 in 0 : vector<1x8x8xbf16>, vector<1x8x8xbf16>, vector<1x8x8xbf16>, vector<1x8x8xbf16> -> vector<4x8x8xbf16>
    %28 = vector.extract_strided_slice %22 {offsets = [0, 0, 32], sizes = [1, 8, 8], strides = [1, 1, 1]} : vector<1x8x96xbf16> to vector<1x8x8xbf16>
    %29 = vector.extract_strided_slice %22 {offsets = [0, 0, 40], sizes = [1, 8, 8], strides = [1, 1, 1]} : vector<1x8x96xbf16> to vector<1x8x8xbf16>
    %30 = vector.extract_strided_slice %22 {offsets = [0, 0, 48], sizes = [1, 8, 8], strides = [1, 1, 1]} : vector<1x8x96xbf16> to vector<1x8x8xbf16>
    %31 = vector.extract_strided_slice %22 {offsets = [0, 0, 56], sizes = [1, 8, 8], strides = [1, 1, 1]} : vector<1x8x96xbf16> to vector<1x8x8xbf16>
    %32 = tpu.concatenate %28, %29, %30, %31 in 0 : vector<1x8x8xbf16>, vector<1x8x8xbf16>, vector<1x8x8xbf16>, vector<1x8x8xbf16> -> vector<4x8x8xbf16>
    %33 = vector.extract_strided_slice %22 {offsets = [0, 0, 64], sizes = [1, 8, 8], strides = [1, 1, 1]} : vector<1x8x96xbf16> to vector<1x8x8xbf16>
    %34 = vector.extract_strided_slice %22 {offsets = [0, 0, 72], sizes = [1, 8, 8], strides = [1, 1, 1]} : vector<1x8x96xbf16> to vector<1x8x8xbf16>
    %35 = vector.extract_strided_slice %22 {offsets = [0, 0, 80], sizes = [1, 8, 8], strides = [1, 1, 1]} : vector<1x8x96xbf16> to vector<1x8x8xbf16>
    %36 = vector.extract_strided_slice %22 {offsets = [0, 0, 88], sizes = [1, 8, 8], strides = [1, 1, 1]} : vector<1x8x96xbf16> to vector<1x8x8xbf16>
    %37 = tpu.concatenate %33, %34, %35, %36 in 0 : vector<1x8x8xbf16>, vector<1x8x8xbf16>, vector<1x8x8xbf16>, vector<1x8x8xbf16> -> vector<4x8x8xbf16>
    "tpu.trace_start"() <{level = 10 : i32, message = "nqd,nkd->nqk"}> : () -> ()
    %cst_10 = arith.constant dense<0.000000e+00> : vector<4x8x8xf32>
    %38 = tpu.matmul %27, %32, %cst_10 {dimension_numbers = #tpu.dot_dimension_numbers<[2], [2], [1], [1], [0, 0, 0, 1, 1, 1], [0], [0]>} : vector<4x8x8xbf16>, vector<4x8x8xbf16>, vector<4x8x8xf32> -> vector<4x8x8xf32>
    "tpu.trace_stop"() : () -> ()
    %cst_11 = arith.constant dense<0xFF800000> : vector<4x8xf32>
    %39 = vector.multi_reduction <maximumf>, %38, %cst_11 [2] : vector<4x8x8xf32> to vector<4x8xf32>
    %40 = vector.shape_cast %39 : vector<4x8xf32> to vector<4x8x1xf32>
    %41 = vector.broadcast %40 : vector<4x8x1xf32> to vector<4x8x8xf32>
    %42 = arith.subf %38, %41 : vector<4x8x8xf32>
    %43 = math.exp %42 : vector<4x8x8xf32>
    %cst_12 = arith.constant dense<0.000000e+00> : vector<4x8xf32>
    %44 = vector.multi_reduction <add>, %43, %cst_12 [2] : vector<4x8x8xf32> to vector<4x8xf32>
    %45 = vector.shape_cast %44 : vector<4x8xf32> to vector<4x8x1xf32>
    %46 = tpu.reciprocal %45 : vector<4x8x1xf32> -> vector<4x8x1xf32>
    %47 = vector.broadcast %46 : vector<4x8x1xf32> to vector<4x8x8xf32>
    %48 = arith.mulf %43, %47 : vector<4x8x8xf32>
    %cst_13 = arith.constant dense<0.000000e+00> : vector<8x8xf32>
    %49 = vector.multi_reduction <add>, %48, %cst_13 [0] : vector<4x8x8xf32> to vector<8x8xf32>
    %cst_14 = arith.constant 4.000000e+00 : f32
    %50 = vector.broadcast %cst_14 : f32 to vector<8x8xf32>
    %51 = arith.divf %49, %50 : vector<8x8xf32>
    %c0_15 = arith.constant 0 : index
    %c0_16 = arith.constant 0 : index
    %c0_17 = arith.constant 0 : index
    %52 = vector.load %arg10[%c0_15, %c0_16, %c0_17] : memref<1x8x8xf32, #tpu.memory_space<vmem>>, vector<1x8x8xf32>
    %53 = vector.shape_cast %52 : vector<1x8x8xf32> to vector<8x8xf32>
    %54 = vector.shape_cast %51 : vector<8x8xf32> to vector<1x8x8xf32>
    tpu.vector_store %arg10[%c0_15, %c0_16, %c0_17], %54 {strides = array<i32>} : memref<1x8x8xf32, #tpu.memory_space<vmem>>, vector<1x8x8xf32>,
    %55 = arith.truncf %48 : vector<4x8x8xf32> to vector<4x8x8xbf16>
    "tpu.trace_start"() <{level = 10 : i32, message = "nqk,nkd->nqd"}> : () -> ()
    %cst_18 = arith.constant dense<0.000000e+00> : vector<4x8x8xf32>
    %56 = tpu.matmul %55, %37, %cst_18 {dimension_numbers = #tpu.dot_dimension_numbers<[2], [1], [1], [2], [0, 0, 0, 1, 1, 2], [0], [0]>} : vector<4x8x8xbf16>, vector<4x8x8xbf16>, vector<4x8x8xf32> -> vector<4x8x8xf32>
    "tpu.trace_stop"() : () -> ()
    %57 = vector.extract_strided_slice %56 {offsets = [0, 0, 0], sizes = [1, 8, 8], strides = [1, 1, 1]} : vector<4x8x8xf32> to vector<1x8x8xf32>
    %58 = vector.shape_cast %57 : vector<1x8x8xf32> to vector<8x8xf32>
    %c0_19 = arith.constant 0 : index
    %c0_20 = arith.constant 0 : index
    %59 = vector.load %arg11[%c0_19, %c0_20] : memref<8x32xf32, #tpu.memory_space<vmem>>, vector<8x8xf32>
    tpu.vector_store %arg11[%c0_19, %c0_20], %58 {strides = array<i32>} : memref<8x32xf32, #tpu.memory_space<vmem>>, vector<8x8xf32>,
    %60 = vector.extract_strided_slice %56 {offsets = [1, 0, 0], sizes = [1, 8, 8], strides = [1, 1, 1]} : vector<4x8x8xf32> to vector<1x8x8xf32>
    %61 = vector.shape_cast %60 : vector<1x8x8xf32> to vector<8x8xf32>
    %c0_21 = arith.constant 0 : index
    %c8 = arith.constant 8 : index
    %62 = vector.load %arg11[%c0_21, %c8] : memref<8x32xf32, #tpu.memory_space<vmem>>, vector<8x8xf32>
    tpu.vector_store %arg11[%c0_21, %c8], %61 {strides = array<i32>} : memref<8x32xf32, #tpu.memory_space<vmem>>, vector<8x8xf32>,
    %63 = vector.extract_strided_slice %56 {offsets = [2, 0, 0], sizes = [1, 8, 8], strides = [1, 1, 1]} : vector<4x8x8xf32> to vector<1x8x8xf32>
    %64 = vector.shape_cast %63 : vector<1x8x8xf32> to vector<8x8xf32>
    %c0_22 = arith.constant 0 : index
    %c16 = arith.constant 16 : index
    %65 = vector.load %arg11[%c0_22, %c16] : memref<8x32xf32, #tpu.memory_space<vmem>>, vector<8x8xf32>
    tpu.vector_store %arg11[%c0_22, %c16], %64 {strides = array<i32>} : memref<8x32xf32, #tpu.memory_space<vmem>>, vector<8x8xf32>,
    %66 = vector.extract_strided_slice %56 {offsets = [3, 0, 0], sizes = [1, 8, 8], strides = [1, 1, 1]} : vector<4x8x8xf32> to vector<1x8x8xf32>
    %67 = vector.shape_cast %66 : vector<1x8x8xf32> to vector<8x8xf32>
    %c0_23 = arith.constant 0 : index
    %c24 = arith.constant 24 : index
    %68 = vector.load %arg11[%c0_23, %c24] : memref<8x32xf32, #tpu.memory_space<vmem>>, vector<8x8xf32>
    tpu.vector_store %arg11[%c0_23, %c24], %67 {strides = array<i32>} : memref<8x32xf32, #tpu.memory_space<vmem>>, vector<8x8xf32>,
    %c0_24 = arith.constant 0 : index
    %c0_25 = arith.constant 0 : index
    %69 = vector.load %arg11[%c0_24, %c0_25] : memref<8x32xf32, #tpu.memory_space<vmem>>, vector<8x32xf32>
    %70 = arith.truncf %69 : vector<8x32xf32> to vector<8x32xbf16>
    %c0_26 = arith.constant 0 : index
    %c0_27 = arith.constant 0 : index
    %c0_28 = arith.constant 0 : index
    %71 = vector.load %arg5[%c0_26, %c0_27, %c0_28] : memref<1x32x32xbf16, #tpu.memory_space<vmem>>, vector<1x32x32xbf16>
    %72 = vector.shape_cast %71 : vector<1x32x32xbf16> to vector<32x32xbf16>
    %cst_29 = arith.constant dense<0.000000e+00> : vector<8x32xf32>
    %73 = tpu.matmul %70, %72, %cst_29 {dimension_numbers = #tpu.dot_dimension_numbers<[1], [0], [0], [1], [0, 0, 1, 1], [], []>} : vector<8x32xbf16>, vector<32x32xbf16>, vector<8x32xf32> -> vector<8x32xf32>
    %74 = vector.broadcast %9 : vector<1x32xf32> to vector<8x32xf32>
    %75 = arith.addf %73, %74 : vector<8x32xf32>
    %76 = arith.addf %5, %75 : vector<8x32xf32>
    %cst_30 = arith.constant dense<0.000000e+00> : vector<8xf32>
    %77 = vector.multi_reduction <add>, %76, %cst_30 [1] : vector<8x32xf32> to vector<8xf32>
    %78 = vector.shape_cast %77 : vector<8xf32> to vector<8x1xf32>
    %cst_31 = arith.constant 3.200000e+01 : f32
    %79 = vector.broadcast %cst_31 : f32 to vector<8x1xf32>
    %80 = arith.divf %78, %79 : vector<8x1xf32>
    %81 = vector.broadcast %80 : vector<8x1xf32> to vector<8x32xf32>
    %82 = arith.subf %76, %81 : vector<8x32xf32>
    %83 = arith.mulf %82, %82 : vector<8x32xf32>
    %cst_32 = arith.constant dense<0.000000e+00> : vector<8xf32>
    %84 = vector.multi_reduction <add>, %83, %cst_32 [1] : vector<8x32xf32> to vector<8xf32>
    %85 = vector.shape_cast %84 : vector<8xf32> to vector<8x1xf32>
    %cst_33 = arith.constant 3.200000e+01 : f32
    %86 = vector.broadcast %cst_33 : f32 to vector<8x1xf32>
    %87 = arith.divf %85, %86 : vector<8x1xf32>
    %88 = vector.broadcast %80 : vector<8x1xf32> to vector<8x32xf32>
    %89 = arith.subf %76, %88 : vector<8x32xf32>
    %cst_34 = arith.constant 9.99999974E-6 : f32
    %90 = vector.broadcast %cst_34 : f32 to vector<8x1xf32>
    %91 = arith.addf %87, %90 : vector<8x1xf32>
    %92 = math.rsqrt %91 : vector<8x1xf32>
    %93 = vector.broadcast %92 : vector<8x1xf32> to vector<8x32xf32>
    %94 = arith.mulf %89, %93 : vector<8x32xf32>
    %95 = vector.broadcast %11 : vector<1x32xf32> to vector<8x32xf32>
    %96 = arith.mulf %94, %95 : vector<8x32xf32>
    %97 = vector.broadcast %12 : vector<1x32xf32> to vector<8x32xf32>
    %98 = arith.addf %96, %97 : vector<8x32xf32>
    %99 = arith.truncf %98 : vector<8x32xf32> to vector<8x32xbf16>
    %cst_35 = arith.constant 0.000000e+00 : f32
    %100 = vector.broadcast %cst_35 : f32 to vector<8x32xf32>
    %c0_36 = arith.constant 0 : index
    %c0_37 = arith.constant 0 : index
    %c0_38 = arith.constant 0 : index
    %101 = vector.load %arg6[%c0_36, %c0_37, %c0_38] : memref<1x32x64xbf16, #tpu.memory_space<vmem>>, vector<1x32x64xbf16>
    %102 = vector.shape_cast %101 : vector<1x32x64xbf16> to vector<32x64xbf16>
    %cst_39 = arith.constant dense<0.000000e+00> : vector<8x64xf32>
    %103 = tpu.matmul %99, %102, %cst_39 {dimension_numbers = #tpu.dot_dimension_numbers<[1], [0], [0], [1], [0, 0, 1, 1], [], []>} : vector<8x32xbf16>, vector<32x64xbf16>, vector<8x64xf32> -> vector<8x64xf32>
    %104 = vector.extract_strided_slice %7 {offsets = [2, 0], sizes = [1, 64], strides = [1, 1]} : vector<8x96xf32> to vector<1x64xf32>
    %105 = vector.broadcast %104 : vector<1x64xf32> to vector<8x64xf32>
    %106 = arith.addf %103, %105 : vector<8x64xf32>
    %cst_40 = arith.constant 0.000000e+00 : f32
    %107 = vector.broadcast %cst_40 : f32 to vector<8x64xf32>
    %108 = arith.maximumf %106, %107 : vector<8x64xf32>
    %109 = arith.truncf %108 : vector<8x64xf32> to vector<8x64xbf16>
    %c0_41 = arith.constant 0 : index
    %c0_42 = arith.constant 0 : index
    %c0_43 = arith.constant 0 : index
    %110 = vector.load %arg7[%c0_41, %c0_42, %c0_43] : memref<1x64x32xbf16, #tpu.memory_space<vmem>>, vector<1x64x32xbf16>
    %111 = vector.shape_cast %110 : vector<1x64x32xbf16> to vector<64x32xbf16>
    %cst_44 = arith.constant dense<0.000000e+00> : vector<8x32xf32>
    %112 = tpu.matmul %109, %111, %cst_44 {dimension_numbers = #tpu.dot_dimension_numbers<[1], [0], [0], [1], [0, 0, 1, 1], [], []>} : vector<8x64xbf16>, vector<64x32xbf16>, vector<8x32xf32> -> vector<8x32xf32>
    %113 = arith.addf %100, %112 : vector<8x32xf32>
    %114 = vector.broadcast %10 : vector<1x32xf32> to vector<8x32xf32>
    %115 = arith.addf %113, %114 : vector<8x32xf32>
    %116 = arith.addf %98, %115 : vector<8x32xf32>
    %cst_45 = arith.constant dense<0.000000e+00> : vector<8xf32>
    %117 = vector.multi_reduction <add>, %116, %cst_45 [1] : vector<8x32xf32> to vector<8xf32>
    %118 = vector.shape_cast %117 : vector<8xf32> to vector<8x1xf32>
    %cst_46 = arith.constant 3.200000e+01 : f32
    %119 = vector.broadcast %cst_46 : f32 to vector<8x1xf32>
    %120 = arith.divf %118, %119 : vector<8x1xf32>
    %121 = vector.broadcast %120 : vector<8x1xf32> to vector<8x32xf32>
    %122 = arith.subf %116, %121 : vector<8x32xf32>
    %123 = arith.mulf %122, %122 : vector<8x32xf32>
    %cst_47 = arith.constant dense<0.000000e+00> : vector<8xf32>
    %124 = vector.multi_reduction <add>, %123, %cst_47 [1] : vector<8x32xf32> to vector<8xf32>
    %125 = vector.shape_cast %124 : vector<8xf32> to vector<8x1xf32>
    %cst_48 = arith.constant 3.200000e+01 : f32
    %126 = vector.broadcast %cst_48 : f32 to vector<8x1xf32>
    %127 = arith.divf %125, %126 : vector<8x1xf32>
    %128 = vector.broadcast %120 : vector<8x1xf32> to vector<8x32xf32>
    %129 = arith.subf %116, %128 : vector<8x32xf32>
    %cst_49 = arith.constant 9.99999974E-6 : f32
    %130 = vector.broadcast %cst_49 : f32 to vector<8x1xf32>
    %131 = arith.addf %127, %130 : vector<8x1xf32>
    %132 = math.rsqrt %131 : vector<8x1xf32>
    %133 = vector.broadcast %132 : vector<8x1xf32> to vector<8x32xf32>
    %134 = arith.mulf %129, %133 : vector<8x32xf32>
    %135 = vector.broadcast %13 : vector<1x32xf32> to vector<8x32xf32>
    %136 = arith.mulf %134, %135 : vector<8x32xf32>
    %137 = vector.broadcast %14 : vector<1x32xf32> to vector<8x32xf32>
    %138 = arith.addf %136, %137 : vector<8x32xf32>
    %c0_50 = arith.constant 0 : index
    %c0_51 = arith.constant 0 : index
    %139 = vector.load %arg9[%c0_50, %c0_51] : memref<8x32xf32, #tpu.memory_space<vmem>>, vector<8x32xf32>
    tpu.vector_store %arg9[%c0_50, %c0_51], %138 {strides = array<i32>} : memref<8x32xf32, #tpu.memory_space<vmem>>, vector<8x32xf32>,
    return
  }
  func.func @transform_0(%arg0: i32, %arg1: i32) -> (i32, i32) {
    %c0_i32 = arith.constant 0 : i32
    %c0_i32_0 = arith.constant 0 : i32
    return %arg0, %c0_i32 : i32, i32
  }
  func.func @transform_1(%arg0: i32, %arg1: i32) -> (i32, i32) {
    %c0_i32 = arith.constant 0 : i32
    %c0_i32_0 = arith.constant 0 : i32
    return %arg0, %c0_i32 : i32, i32
  }
  func.func @transform_2(%arg0: i32, %arg1: i32) -> (i32, i32, i32) {
    %c0_i32 = arith.constant 0 : i32
    %c0_i32_0 = arith.constant 0 : i32
    %c0_i32_1 = arith.constant 0 : i32
    return %arg1, %c0_i32, %c0_i32_0 : i32, i32, i32
  }
  func.func @transform_3(%arg0: i32, %arg1: i32) -> (i32, i32, i32) {
    %c0_i32 = arith.constant 0 : i32
    %c0_i32_0 = arith.constant 0 : i32
    %c0_i32_1 = arith.constant 0 : i32
    return %arg1, %c0_i32, %c0_i32_0 : i32, i32, i32
  }
  func.func @transform_4(%arg0: i32, %arg1: i32) -> (i32, i32, i32) {
    %c0_i32 = arith.constant 0 : i32
    %c0_i32_0 = arith.constant 0 : i32
    %c0_i32_1 = arith.constant 0 : i32
    return %arg1, %c0_i32, %c0_i32_0 : i32, i32, i32
  }
  func.func @transform_5(%arg0: i32, %arg1: i32) -> (i32, i32, i32) {
    %c0_i32 = arith.constant 0 : i32
    %c0_i32_0 = arith.constant 0 : i32
    %c0_i32_1 = arith.constant 0 : i32
    return %arg1, %c0_i32, %c0_i32_0 : i32, i32, i32
  }
  func.func @transform_6(%arg0: i32, %arg1: i32) -> (i32, i32, i32) {
    %c0_i32 = arith.constant 0 : i32
    %c0_i32_0 = arith.constant 0 : i32
    %c0_i32_1 = arith.constant 0 : i32
    return %arg1, %c0_i32, %c0_i32_0 : i32, i32, i32
  }
  func.func @transform_7(%arg0: i32, %arg1: i32) -> (i32, i32) {
    %c0_i32 = arith.constant 0 : i32
    %c0_i32_0 = arith.constant 0 : i32
    return %arg0, %c0_i32 : i32, i32
  }
  func.func @transform_8(%arg0: i32, %arg1: i32) -> (i32, i32, i32) {
    %c0_i32 = arith.constant 0 : i32
    %c0_i32_0 = arith.constant 0 : i32
    return %arg1, %arg0, %c0_i32 : i32, i32, i32
  }
}

</mosaic_0001>

<bundles_post_ra>
// kernel: tpu_custom_call.1
= control target key start
LH: loop header
LB: loop body
LE: loop exit
PB: predicated region body
PF: predicated region fallthrough
CT: control target
= control target key end

     0   :  { %s3274_s0 = inlined_call_operand.hbm [shape: f32[16,32], index: 0, kind: input, shape index: {}]   ;;  %s3275_s1 = inlined_call_operand.hbm [shape: f32[16,32], index: 1, kind: input, shape index: {}]   ;;  %s3276_s2 = inlined_call_operand.hbm [shape: bf16[2,32,96], index: 2, kind: input, shape index: {}]   ;;  %s3277_s3 = inlined_call_operand.hbm [shape: bf16[2,32,32], index: 3, kind: input, shape index: {}]   ;;  %s3278_s4 = inlined_call_operand.hbm [shape: bf16[2,32,64], index: 4, kind: input, shape index: {}]   ;;  %s3279_s5 = inlined_call_operand.hbm [shape: bf16[2,64,32], index: 5, kind: input, shape index: {}]   ;;  %s3280_s6 = inlined_call_operand.hbm [shape: f32[2,8,96], index: 6, kind: input, shape index: {}]   ;;  %s3281_s7 = inlined_call_operand.hbm [shape: f32[16,32], index: 7, kind: output, shape index: {0}]   ;;  %s3282_s8 = inlined_call_operand.hbm [shape: f32[2,16,8], index: 8, kind: output, shape index: {1}]  }
   0x1   :  { %3323 = sst [smem:[#allocation47_spill]] %s3275_s1 }
   0x2   :  { %3324 = sst [smem:[#allocation48_spill]] %s3277_s3 }
   0x3   :  { %3325 = sst [smem:[#allocation49_spill]] %s3281_s7 }
   0x4   :  { %3326 = sst [smem:[#allocation50_spill]] %s3282_s8 }
   0x5   :  { %14 = vsyncpa [#allocation4], 0 }
   0x6   :  { %16 = vsyncpa [#allocation4 + $0x1], 0 }
   0x7   :  { %17 = vsyncpa [#allocation7], 0 }
   0x8   :  { %19 = vsyncpa [#allocation7 + $0x1], 0 }
   0x9   :  { %20 = vsyncpa [#allocation10], 0 }
   0xa   :  { %22 = vsyncpa [#allocation10 + $0x1], 0 }
   0xb   :  { %23 = vsyncpa [#allocation13], 0 }
   0xc   :  { %25 = vsyncpa [#allocation13 + $0x1], 0 }
   0xd   :  { %26 = vsyncpa [#allocation5], 0 }
   0xe   :  { %28 = vsyncpa [#allocation5 + $0x1], 0 }
   0xf   :  { %29 = vsyncpa [#allocation17], 0 }
  0x10   :  { %31 = vsyncpa [#allocation17 + $0x1], 0  ;;  %s2513_s27 = smov 0   ;;  %s2515_s28 = smov 0  }
  0x11   :  { %s2517_s29 = smov 0   ;;  %s2519_s30 = smov 0  }
  0x12   :  { %s2521_s9 = smov 0   ;;  %s2523_s10 = smov 0  }
  0x13   :  { %s2525_s11 = smov 0   ;;  %s2527_s12 = smov 0  }
  0x14   :  { %s2529_s13 = smov 0   ;;  %s2531_s14 = smov 0  }
  0x15   :  { %s2533_s15 = smov 0   ;;  %s2535_s16 = smov 0  }
  0x16   :  { %s2537_s17 = smov 0   ;;  %s2539_s18 = smov 0  }
  0x17 LB: > { %3327 = sst [smem:[#allocation25_spill]] %s2393_s27  ;;  %s2584_s19 = sadd.s32 4294967295, %s2445_s18   ;;  %s2445_s18 = sphi %s2539_s18, %s37_s18   ;;  %s2441_s17 = sphi %s2537_s17, %s3419_s17   ;;  %s2437_s16 = sphi %s2535_s16, %s3418_s16   ;;  %s2433_s15 = sphi %s2533_s15, %s3417_s15   ;;  %s2429_s14 = sphi %s2531_s14, %s3416_s14   ;;  %s2425_s13 = sphi %s2529_s13, %s3415_s13   ;;  %s2421_s12 = sphi %s2527_s12, %s3414_s12   ;;  %s2417_s11 = sphi %s2525_s11, %s3410_s11   ;;  %s2413_s10 = sphi %s2523_s10, %s3409_s10   ;;  %s2409_s9 = sphi %s2521_s9, %s3408_s9   ;;  %s2405_s30 = sphi %s2519_s30, %s3407_s30   ;;  %s2401_s29 = sphi %s2517_s29, %s3406_s29   ;;  %s2397_s28 = sphi %s2515_s28, %s3405_s28   ;;  %s2393_s27 = sphi %s2513_s27, %s3404_s27  }
  0x18   : > { %3328 = sst [smem:[#allocation26_spill]] %s2397_s28  ;;  %s1659_s20 = sadd.s32 4294967294, %s2445_s18  }
  0x19   : > { %3329 = sst [smem:[#allocation27_spill]] %s2401_s29  ;;  %s46_s21 = sadd.s32 1, %s2437_s16 }
  0x1a   : > { %3330 = sst [smem:[#allocation28_spill]] %s2409_s9  ;;  %s49_s22 = sadd.s32 1, %s2441_s17 }
  0x1b   : > { %3331 = sst [smem:[#allocation29_spill]] %s2413_s10  ;;  %p47_p0 = scmp.ge.s32.totalorder %s46_s21, 2 }
  0x1c   : > { %3332 = sst [smem:[#allocation30_spill]] %s2417_s11  ;;  %s56_s23 = sadd.s32 1, %s2425_s13 }
  0x1d   : > { %3333 = sst [smem:[#allocation31_spill]] %s2421_s12  ;;  %p63_p1 = scmp.ne.s32.totalorder %s2425_s13, %s2421_s12 }
  0x1e   : > { %3334 = sst [smem:[#allocation32_spill]] %s2429_s14  ;;  %p64_p2 = scmp.eq.s32.totalorder %s2445_s18, 0 }
  0x1f   : > { %3335 = sst [smem:[#allocation33_spill]] %s2433_s15  ;;  %s3421_s21 = smov (%p47_p0, %s46_s21), 0 }
  0x20   : > { %3336 = sst [smem:[#allocation34_spill]] %s2445_s18  ;;  %s3423_s22 = smov (!%p47_p0, %s49_s22), %s2441_s17 }
  0x21   : > { %3337 = sst [smem:[#allocation35_spill]] %s2584_s19  ;;  %p2601_p3 = por %p64_p2, %p63_p1 }
  0x22   : > { %3338 = sst [smem:[#allocation36_spill]] %s3421_s21  ;;  %p69_p4 = scmp.ne.s32.totalorder %s2421_s12, %s2417_s11 }
  0x23   : > { %p51_p5 = scmp.ge.s32.totalorder %s3423_s22, 2  ;;  %p70_p6 = scmp.eq.s32.totalorder %s2584_s19, 0 }
  0x24   : > { %s105_s25 = ssub.s32 %s2437_s16, %s3421_s21  ;;  %s108_s26 = sadd.s32 1, %s2413_s10 }
  0x25   : > { %s3425_s22 = smov (%p51_p5, %s3423_s22), 0  ;;  %p2618_p7 = por %p70_p6, %p69_p4 }
  0x26   : > { %3340 = sst [smem:[#allocation37_spill]] %s3425_s22  ;;  %p106_p8 = scmp.eq.s32.totalorder %s105_s25, 0 }
  0x27   : > { %s3341_s7 = scalar_select %p2618_p7, 1, 0 }
  0x28   : > { %s53_s8 = ssub.s32 %s2441_s17, %s3425_s22  ;;  %p115_p9 = scmp.ne.s32.totalorder %s2413_s10, %s2409_s9 }
  0x29   : > { %3342 = sst [smem:[#allocation38_spill]] %s3341_s7  ;;  %p54_p10 = scmp.eq.s32.totalorder %s53_s8, 0 }
  0x2a   : > { %p121_p11 = scmp.ne.s32.totalorder %s2409_s9, %s2405_s30  ;;  %p2636_p12 = por %p115_p9, %p64_p2 }
  0x2b   : > { %s2629_s21 = scalar_select %p106_p8, %s2413_s10, %s108_s26  }
  0x2c   : > { %s2632_s15 = scalar_select %p54_p10, %s2425_s13, %s56_s23  }
  0x2d   : > { %3343 = sst [smem:[#allocation39_spill]] %s2629_s21  ;;  %p2642_p13 = por %p121_p11, %p70_p6 }
  0x2e   : > { %3344 = sst [smem:[#allocation40_spill]] %s2632_s15  ;;  %p249_p0 = scmp.eq.s32.totalorder %s2584_s19, 3 }
  0x2f   : > { %s3346_s22 = scalar_select %p2642_p13, 1, 0 }
  0x30   : > { %p255_p5 = scmp.eq.s32.totalorder %s1659_s20, 3  ;;  %s263_s30 = sor.u32 %s105_s25, %s53_s8 }
  0x31   : > { %3347 = sst [smem:[#allocation41_spill]] %s3346_s22  ;;  %s266_s23 = sadd.s32 1, %s2401_s29 }
  0x32   : > { %p2651_p8 = por %p249_p0, %p63_p1  ;;  %p2658_p2 = por %p255_p5, %p69_p4 }
  0x33   : > { %p264_p6 = scmp.eq.s32.totalorder %s263_s30, 0  ;;  %p276_p9 = scmp.ne.s32.totalorder %s2401_s29, %s2397_s28 }
  0x34   : > { %s3348_s26 = scalar_select %p2651_p8, 1, 0 }
  0x35   : > { %s3350_s15 = scalar_select %p2658_p2, 1, 0 }
  0x36   : > { %3349 = sst [smem:[#allocation42_spill]] %s3348_s26  ;;  %p282_p10 = scmp.ne.s32.totalorder %s2397_s28, %s2393_s27 }
  0x37   : > { %3351 = sst [smem:[#allocation43_spill]] %s3350_s15  ;;  %p2669_p11 = por %p276_p9, %p249_p0 }
  0x38   : > { %s2667_s21 = scalar_select %p264_p6, %s2401_s29, %s266_s23  }
  0x39   : > { %s3353_s8 = scalar_select %p2669_p11, 1, 0 }
  0x3a   : > { %3352 = sst [smem:[#allocation44_spill]] %s2667_s21  ;;  %p2673_p13 = por %p282_p10, %p255_p5 }
  0x3b   : > { %3354 = sst [smem:[#allocation45_spill]] %s3353_s8  ;;  %p1885_p1 = scmp.lt.s32.totalorder %s2445_s18, 4 }
  0x3c   : > { %s3355_s20 = scalar_select %p2673_p13, 1, 0 }
  0x3d   : > { %s3293_s25 = sand.u32 1, %s2425_s13   ;;  %s3299_s15 = sshll.u32 %s2441_s17, 7 }
  0x3e   : > { %3356 = sst [smem:[#allocation46_spill]] %s3355_s20  ;;  %s2681_s11 = sshll.u32 %s3293_s25, 3 }
  0x3f   : > { %p2686_p4 = pnand %p1885_p1, %p2601_p3  ;;  %s2691_s23 = sand.u32 1, %s2445_s18  }
  0x40   : > { %s3358_s1 = sld [smem:[#allocation47_spill]]  ;;  %s325_s24 = scalar_lea.vmem [#allocation6], %s2681_s11 }
  0x41   : > { %s3357_s30 = scalar_select %p2686_p4, 1, 0 }
  0x42   : > { %s332_s25 = sshll.u32 %s325_s24, 4  ;;  %p2703_p3 = pnand %p1885_p1, %p2636_p12  ;;  %s2707_s25 = int_to_ptr.vmem [resolvable:$true] %s332_s25 }
  0x43   : > { %p3310_p5 = pneg %p2686_p4 }
  0x44   : > { %s3359_s27 = scalar_select %p2703_p3, 1, 0 }
  0x46   : > { %s2698_s20 = scalar_lea.hbm %s3358_s1, %s3299_s15  ;;  %s2046_s24 = scalar_lea.hbm %s3358_s1, 256 }
  0x47   : > { %s2041_s8 = scalar_lea.hbm %s2698_s20, 128  ;;  %p2047_p12 = scmp.lt.u32.totalorder %s2698_s20, %s3358_s1 }
  0x48   : > { %p2042_p0 = scmp.ne.s32.totalorder %s2698_s20, %s2041_s8  ;;  %p2048_p10 = scmp.lt.u32.totalorder %s2046_s24, %s2041_s8 }
  0x49   : > { %p2050_p13 = scmp.lt.u32.totalorder %s2041_s8, %s2698_s20 }
  0x4a   : > { %p2044_p6 = pnand %p3310_p5, %p2042_p0  ;;  %p2049_p1 = por %p2048_p10, %p2047_p12 }
  0x4c   : > { %p2045_p9 = pneg %p2044_p6  ;;  %p2051_p2 = por %p2050_p13, %p2049_p1 }
  0x4e   : > { %p2052_p8 = pnand %p2051_p2, %p2045_p9 }
  0x50   : > { %2055 = shalt.err (!%p2052_p8)
}
  0x51   : > { %s2056_s26 = scalar_lea.vmem %s2707_s25, 128  ;;  %s2447_s29 = smov [#allocation6]  }
  0x52   : > { %p2057_p0 = scmp.ne.s32.totalorder %s2707_s25, %s2056_s26  ;;  %s2061_s21 = sshll.u32 %s2447_s29, 4  ;;  %s2062_s21 = int_to_ptr.vmem [resolvable:$false] %s2061_s21 }
  0x53   : > { %s2063_s15 = scalar_lea.vmem %s2062_s21, 256  ;;  %p2064_p7 = scmp.lt.s32.totalorder %s2707_s25, %s2062_s21 }
  0x54   : > { %p2059_p6 = pnand %p2057_p0, %p3310_p5  ;;  %p2065_p12 = scmp.lt.s32.totalorder %s2063_s15, %s2056_s26 }
  0x56   : > { %p2060_p11 = pneg %p2059_p6  ;;  %p2066_p10 = por %p2065_p12, %p2064_p7 }
  0x58   : > { %p2067_p13 = pnand %p2066_p10, %p2060_p11 }
  0x5a   : > { %2070 = shalt.err (!%p2067_p13)
}
  0x5b   : > { %s3360_s8 = scalar_lea.sflag [#allocation7], %s2691_s23  ;;  %p1680_p8 = scmp.ge.s32.totalorder %s2445_s18, 1 }
  0x5c   : > { %1862 = dma.hbm_to_vmem [thread:$0]  (!%p2686_p4), %s2698_s20, 128, %s2707_s25, %s3360_s8  }
  0x5d   : > { %p439_p2 = scmp.lt.s32.totalorder %s2445_s18, 5  ;;  %s2740_s24 = sand.u32 1, %s2413_s10  }
  0x5e   : > { %s2743_s26 = sshll.u32 %s2437_s16, 8  ;;  %s2750_s29 = sshll.u32 %s2740_s24, 4 }
  0x5f   : > { %p2745_p7 = pnand %p1680_p8, %p439_p2  ;;  %s3362_s3 = sld [smem:[#allocation48_spill]] }
  0x60   : > { %s364_s25 = scalar_lea.vmem [#allocation9], %s2750_s29  ;;  %p2767_p9 = pneg %p2703_p3 }
  0x61   : > { %s3361_s14 = scalar_select %p2745_p7, 1, 0 }
  0x62   : > { %s371_s8 = sshll.u32 %s364_s25, 4  ;;  %s2760_s8 = int_to_ptr.vmem [resolvable:$true] %s371_s8 }
  0x63   : > { %s3363_s28 = scalar_select %p2767_p9, 1, 0 }
  0x65   : > { %s2756_s20 = scalar_lea.hbm %s3362_s3, %s2743_s26  ;;  %s2076_s22 = scalar_lea.hbm %s3362_s3, 512 }
  0x66   : > { %s2071_s18 = scalar_lea.hbm %s2756_s20, 256  ;;  %p2077_p6 = scmp.lt.u32.totalorder %s2756_s20, %s3362_s3 }
  0x67   : > { %p2072_p11 = scmp.ne.s32.totalorder %s2756_s20, %s2071_s18  ;;  %p2078_p12 = scmp.lt.u32.totalorder %s2076_s22, %s2071_s18 }
  0x68   : > { %p2080_p13 = scmp.lt.u32.totalorder %s2071_s18, %s2756_s20 }
  0x69   : > { %p2074_p1 = pnand %p2767_p9, %p2072_p11  ;;  %p2079_p10 = por %p2078_p12, %p2077_p6 }
  0x6b   : > { %p2075_p0 = pneg %p2074_p1  ;;  %p2081_p8 = por %p2080_p13, %p2079_p10 }
  0x6d   : > { %p2082_p2 = pnand %p2081_p8, %p2075_p0 }
  0x6f   : > { %2085 = shalt.err (!%p2082_p2)
}
  0x70   : > { %s2086_s10 = scalar_lea.vmem %s2760_s8, 256  ;;  %s2448_s21 = smov [#allocation9]  }
  0x71   : > { %p2087_p11 = scmp.ne.s32.totalorder %s2760_s8, %s2086_s10  ;;  %s2091_s15 = sshll.u32 %s2448_s21, 4  ;;  %s2092_s15 = int_to_ptr.vmem [resolvable:$false] %s2091_s15 }
  0x72   : > { %s2093_s1 = scalar_lea.vmem %s2092_s15, 512  ;;  %p2094_p7 = scmp.lt.s32.totalorder %s2760_s8, %s2092_s15 }
  0x73   : > { %p2089_p1 = pnand %p2087_p11, %p2767_p9  ;;  %p2095_p4 = scmp.lt.s32.totalorder %s2093_s1, %s2086_s10 }
  0x75   : > { %p2090_p5 = pneg %p2089_p1  ;;  %p2096_p6 = por %p2095_p4, %p2094_p7 }
  0x77   : > { %p2097_p12 = pnand %p2096_p6, %p2090_p5 }
  0x79   : > { %2100 = shalt.err (!%p2097_p12)
}
  0x7a   : > { %s2449_s18 = smov 64   ;;  %s2450_s22 = smov 4  }
  0x7b   : > { %s3364_s25 = scalar_lea.sflag [#allocation10], %s2691_s23  ;;  %s1723_s10 = sshll.u32 %s2437_s16, 9 }
  0x7c   : > { %1868 = dma.hbm_to_vmem [thread:$0]  (!%p2703_p3), %s2756_s20, 256, %s2760_s8, %s3364_s25, %s2449_s18, %s2449_s18, %s2450_s22  }
  0x7d   : > { %s3365_s21 = sshll.u32 %s2740_s24, 5  ;;  %s2801_s19 = scalar_lea.hbm %s3279_s5, %s1723_s10 }
  0x7e   : > { %s406_s15 = scalar_lea.vmem [#allocation12], %s3365_s21  ;;  %s403_s7 = scalar_lea.sflag [#allocation13], %s2691_s23 }
  0x7f   : > { %s413_s1 = sshll.u32 %s406_s15, 4  ;;  %s2101_s12 = scalar_lea.hbm %s2801_s19, 512  ;;  %s2803_s1 = int_to_ptr.vmem [resolvable:$true] %s413_s1 }
  0x80   : > { %p2102_p4 = scmp.ne.s32.totalorder %s2801_s19, %s2101_s12  ;;  %s2106_s25 = scalar_lea.hbm %s3279_s5, 1024 }
  0x81   : > { %p2107_p0 = scmp.lt.u32.totalorder %s2801_s19, %s3279_s5  ;;  %p2108_p10 = scmp.lt.u32.totalorder %s2106_s25, %s2101_s12 }
  0x82   : > { %p2104_p5 = pnand %p2102_p4, %p2767_p9  ;;  %p2110_p8 = scmp.lt.u32.totalorder %s2101_s12, %s2801_s19 }
  0x83   : > { %p2109_p13 = por %p2108_p10, %p2107_p0 }
  0x84   : > { %p2105_p7 = pneg %p2104_p5 }
  0x85   : > { %p2111_p2 = por %p2110_p8, %p2109_p13 }
  0x87   : > { %p2112_p11 = pnand %p2111_p2, %p2105_p7 }
  0x89   : > { %2115 = shalt.err (!%p2112_p11)
}
  0x8a   : > { %s2116_s9 = scalar_lea.vmem %s2803_s1, 512  ;;  %s2451_s10 = smov [#allocation12]  }
  0x8b   : > { %p2117_p1 = scmp.ne.s32.totalorder %s2803_s1, %s2116_s9  ;;  %s2121_s15 = sshll.u32 %s2451_s10, 4  ;;  %s2122_s15 = int_to_ptr.vmem [resolvable:$false] %s2121_s15 }
  0x8c   : > { %s2123_s20 = scalar_lea.vmem %s2122_s15, 1024  ;;  %p2124_p4 = scmp.lt.s32.totalorder %s2803_s1, %s2122_s15 }
  0x8d   : > { %p2119_p6 = pnand %p2117_p1, %p2767_p9  ;;  %p2125_p5 = scmp.lt.s32.totalorder %s2123_s20, %s2116_s9 }
  0x8f   : > { %p2120_p12 = pneg %p2119_p6  ;;  %p2126_p0 = por %p2125_p5, %p2124_p4 }
  0x91   : > { %p2127_p10 = pnand %p2126_p0, %p2120_p12 }
  0x93   : > { %2130 = shalt.err (!%p2127_p10)
}
  0x94   : > { %1874 = dma.hbm_to_vmem [thread:$0]  (!%p2703_p3), %s2801_s19, 512, %s2803_s1, %s403_s7, %s2449_s18, %s2449_s18, %s2450_s22  }
  0x95   : > { %s3366_s12 = sshll.u32 %s2441_s17, 7  ;;  %s307_s3 = scalar_lea.vmem [#allocation3], %s2681_s11 }
  0x96   : > { %s2837_s21 = scalar_lea.hbm %s3274_s0, %s3366_s12  ;;  %s314_s9 = sshll.u32 %s307_s3, 4  ;;  %s315_s9 = int_to_ptr.vmem [resolvable:$true] %s314_s9 }
  0x97   : > { %s3367_s10 = sand.u32 1, %s2425_s13   ;;  %s2131_s20 = scalar_lea.hbm %s2837_s21, 128 }
  0x98   : > { %s304_s15 = scalar_lea.sflag [#allocation4], %s3367_s10  ;;  %p2132_p7 = scmp.ne.s32.totalorder %s2837_s21, %s2131_s20 }
  0x99   : > { %p3368_p13 = scmp.ne.s32.totalorder %s3357_s30, 0  ;;  %s2136_s12 = scalar_lea.hbm %s3274_s0, 256 }
  0x9a   : > { %p2137_p1 = scmp.lt.u32.totalorder %s2837_s21, %s3274_s0  ;;  %p2138_p6 = scmp.lt.u32.totalorder %s2136_s12, %s2131_s20 }
  0x9b   : > { %p3369_p8 = pneg %p3368_p13  ;;  %p2140_p4 = scmp.lt.u32.totalorder %s2131_s20, %s2837_s21 }
  0x9c   : > { %p2139_p12 = por %p2138_p6, %p2137_p1 }
  0x9d   : > { %p2134_p2 = pnand %p2132_p7, %p3369_p8 }
  0x9e   : > { %p2141_p5 = por %p2140_p4, %p2139_p12 }
  0x9f   : > { %p2135_p11 = pneg %p2134_p2 }
  0xa1   : > { %p2142_p0 = pnand %p2141_p5, %p2135_p11 }
  0xa3   : > { %2145 = shalt.err (!%p2142_p0)
}
  0xa4   : > { %s2146_s11 = scalar_lea.vmem %s315_s9, 128  ;;  %p3370_p7 = pmov %p3369_p8 }
  0xa5   : > { %p2147_p10 = scmp.ne.s32.totalorder %s315_s9, %s2146_s11  ;;  %s2452_s3 = smov [#allocation3]  }
  0xa6   : > { %s2151_s10 = sshll.u32 %s2452_s3, 4  ;;  %s2152_s10 = int_to_ptr.vmem [resolvable:$false] %s2151_s10 }
  0xa7   : > { %p2149_p8 = pnand %p2147_p10, %p3370_p7  ;;  %s2153_s19 = scalar_lea.vmem %s2152_s10, 256 }
  0xa8   : > { %p2154_p3 = scmp.lt.s32.totalorder %s315_s9, %s2152_s10  ;;  %p2155_p9 = scmp.lt.s32.totalorder %s2153_s19, %s2146_s11 }
  0xa9   : > { %p2150_p2 = pneg %p2149_p8 }
  0xaa   : > { %p2156_p1 = por %p2155_p9, %p2154_p3 }
  0xac   : > { %p2157_p6 = pnand %p2156_p1, %p2150_p2 }
  0xae   : > { %2160 = shalt.err (!%p2157_p6)
}
  0xaf   : > { %1859 = dma.hbm_to_vmem [thread:$0]  (!%p3368_p13), %s2837_s21, 128, %s315_s9, %s304_s15  }
  0xb0   : > { %s2865_s12 = scalar_lea.hbm %s3276_s2, %s2743_s26  ;;  %s343_s8 = scalar_lea.vmem [#allocation8], %s2750_s29 }
  0xb1   : > { %s350_s25 = sshll.u32 %s343_s8, 4  ;;  %s2161_s11 = scalar_lea.hbm %s2865_s12, 256  ;;  %s2868_s25 = int_to_ptr.vmem [resolvable:$true] %s350_s25 }
  0xb2   : > { %p2162_p3 = scmp.ne.s32.totalorder %s2865_s12, %s2161_s11  ;;  %p3371_p9 = scmp.ne.s32.totalorder %s3363_s28, 0 }
  0xb3   : > { %s2166_s9 = scalar_lea.hbm %s3276_s2, 512  ;;  %p2167_p13 = scmp.lt.u32.totalorder %s2865_s12, %s3276_s2 }
  0xb4   : > { %p2164_p11 = pnand %p2162_p3, %p3371_p9  ;;  %p2168_p4 = scmp.lt.u32.totalorder %s2166_s9, %s2161_s11 }
  0xb5   : > { %p2170_p0 = scmp.lt.u32.totalorder %s2161_s11, %s2865_s12 }
  0xb6   : > { %p2165_p12 = pneg %p2164_p11  ;;  %p2169_p5 = por %p2168_p4, %p2167_p13 }
  0xb8   : > { %p2171_p10 = por %p2170_p0, %p2169_p5 }
  0xba   : > { %p2172_p7 = pnand %p2171_p10, %p2165_p12 }
  0xbc   : > { %2175 = shalt.err (!%p2172_p7)
}
  0xbd   : > { %s2176_s10 = scalar_lea.vmem %s2868_s25, 256  ;;  %s2453_s19 = smov [#allocation8]  }
  0xbe   : > { %p2177_p8 = scmp.ne.s32.totalorder %s2868_s25, %s2176_s10  ;;  %s2181_s20 = sshll.u32 %s2453_s19, 4  ;;  %s2182_s20 = int_to_ptr.vmem [resolvable:$false] %s2181_s20 }
  0xbf   : > { %s2183_s1 = scalar_lea.vmem %s2182_s20, 512  ;;  %p2184_p6 = scmp.lt.s32.totalorder %s2868_s25, %s2182_s20 }
  0xc0   : > { %p2179_p2 = pnand %p2177_p8, %p3371_p9  ;;  %p2185_p3 = scmp.lt.s32.totalorder %s2183_s1, %s2176_s10 }
  0xc2   : > { %p2180_p1 = pneg %p2179_p2  ;;  %p2186_p11 = por %p2185_p3, %p2184_p6 }
  0xc4   : > { %p2187_p13 = pnand %p2186_p11, %p2180_p1 }
  0xc6   : > { %2190 = shalt.err (!%p2187_p13)
}
  0xc7   : > { %p3372_p12 = scmp.ne.s32.totalorder %s3359_s27, 0  ;;  %s3373_s8 = scalar_lea.sflag [#allocation7], %s2691_s23 }
  0xc8   : > { %s2900_s21 = scalar_lea.hbm %s3278_s4, %s2743_s26  ;;  %s385_s9 = scalar_lea.vmem [#allocation11], %s2750_s29 }
  0xc9   : > { %1865 = dma.hbm_to_vmem [thread:$0]  (!%p3372_p12), %s2865_s12, 256, %s2868_s25, %s3373_s8, %s2449_s18, %s2449_s18, %s2450_s22  }
  0xca   : > { %s392_s15 = sshll.u32 %s385_s9, 4  ;;  %s1678_s3 = sshll.u32 %s2740_s24, 3  ;;  %s2903_s15 = int_to_ptr.vmem [resolvable:$true] %s392_s15 }
  0xcb   : > { %s2191_s10 = scalar_lea.hbm %s2900_s21, 256  ;;  %s2196_s19 = scalar_lea.hbm %s3278_s4, 512 }
  0xcc   : > { %p2192_p4 = scmp.ne.s32.totalorder %s2900_s21, %s2191_s10  ;;  %p2197_p10 = scmp.lt.u32.totalorder %s2900_s21, %s3278_s4 }
  0xcd   : > { %p2198_p7 = scmp.lt.u32.totalorder %s2196_s19, %s2191_s10  ;;  %p2200_p2 = scmp.lt.u32.totalorder %s2191_s10, %s2900_s21 }
  0xce   : > { %p2194_p5 = pnand %p2192_p4, %p3371_p9 }
  0xcf   : > { %p2199_p8 = por %p2198_p7, %p2197_p10 }
  0xd0   : > { %p2195_p0 = pneg %p2194_p5 }
  0xd1   : > { %p2201_p1 = por %p2200_p2, %p2199_p8 }
  0xd3   : > { %p2202_p6 = pnand %p2201_p1, %p2195_p0 }
  0xd5   : > { %2205 = shalt.err (!%p2202_p6)
}
  0xd6   : > { %s2206_s29 = scalar_lea.vmem %s2903_s15, 256  ;;  %s2454_s1 = smov [#allocation11]  }
  0xd7   : > { %p2207_p3 = scmp.ne.s32.totalorder %s2903_s15, %s2206_s29  ;;  %s2211_s8 = sshll.u32 %s2454_s1, 4  ;;  %s2212_s8 = int_to_ptr.vmem [resolvable:$false] %s2211_s8 }
  0xd8   : > { %s2213_s11 = scalar_lea.vmem %s2212_s8, 512  ;;  %p2214_p4 = scmp.lt.s32.totalorder %s2903_s15, %s2212_s8 }
  0xd9   : > { %p2209_p11 = pnand %p2207_p3, %p3371_p9  ;;  %p2215_p5 = scmp.lt.s32.totalorder %s2213_s11, %s2206_s29 }
  0xdb   : > { %p2210_p13 = pneg %p2209_p11  ;;  %p2216_p10 = por %p2215_p5, %p2214_p4 }
  0xdd   : > { %p2217_p7 = pnand %p2216_p10, %p2210_p13 }
  0xdf   : > { %2220 = shalt.err (!%p2217_p7)
}
  0xe0   : > { %s3374_s30 = scalar_lea.sflag [#allocation10], %s2691_s23  ;;  %s1679_s9 = sshll.u32 %s2437_s16, 7 }
  0xe1   : > { %1871 = dma.hbm_to_vmem [thread:$0]  (!%p3372_p12), %s2900_s21, 256, %s2903_s15, %s3374_s30, %s2449_s18, %s2449_s18, %s2450_s22  }
  0xe2   : > { %s2936_s25 = scalar_lea.hbm %s3280_s6, %s1679_s9  ;;  %s427_s19 = scalar_lea.vmem [#allocation14], %s1678_s3 }
  0xe3   : > { %s434_s26 = sshll.u32 %s427_s19, 4  ;;  %s2221_s20 = scalar_lea.hbm %s2936_s25, 128  ;;  %s435_s26 = int_to_ptr.vmem [resolvable:$true] %s434_s26 }
  0xe4   : > { %p2222_p0 = scmp.ne.s32.totalorder %s2936_s25, %s2221_s20  ;;  %s2226_s21 = scalar_lea.hbm %s3280_s6, 256 }
  0xe5   : > { %p2227_p1 = scmp.lt.u32.totalorder %s2936_s25, %s3280_s6  ;;  %p2228_p6 = scmp.lt.u32.totalorder %s2226_s21, %s2221_s20 }
  0xe6   : > { %p2224_p8 = pnand %p2222_p0, %p3371_p9  ;;  %p2230_p11 = scmp.lt.u32.totalorder %s2221_s20, %s2936_s25 }
  0xe7   : > { %p2229_p3 = por %p2228_p6, %p2227_p1 }
  0xe8   : > { %p2225_p2 = pneg %p2224_p8 }
  0xe9   : > { %p2231_p13 = por %p2230_p11, %p2229_p3 }
  0xeb   : > { %p2232_p4 = pnand %p2231_p13, %p2225_p2 }
  0xed   : > { %2235 = shalt.err (!%p2232_p4)
}
  0xee   : > { %s2236_s24 = scalar_lea.vmem %s435_s26, 128  ;;  %s2455_s3 = smov [#allocation14]  }
  0xef   : > { %p2237_p5 = scmp.ne.s32.totalorder %s435_s26, %s2236_s24  ;;  %s2241_s1 = sshll.u32 %s2455_s3, 4  ;;  %s2242_s1 = int_to_ptr.vmem [resolvable:$false] %s2241_s1 }
  0xf0   : > { %s2243_s8 = scalar_lea.vmem %s2242_s1, 256  ;;  %p2244_p0 = scmp.lt.s32.totalorder %s435_s26, %s2242_s1 }
  0xf1   : > { %p2239_p10 = pnand %p2237_p5, %p3371_p9  ;;  %p2245_p8 = scmp.lt.s32.totalorder %s2243_s8, %s2236_s24 }
  0xf3   : > { %p2240_p7 = pneg %p2239_p10  ;;  %p2246_p12 = por %p2245_p8, %p2244_p0 }
  0xf5   : > { %p2247_p1 = pnand %p2246_p12, %p2240_p7 }
  0xf7   : > { %2250 = shalt.err (!%p2247_p1)
}
  0xf8   : > { %p3375_p6 = scmp.ne.s32.totalorder %s3359_s27, 0  ;;  %p3376_p2 = scmp.ne.s32.totalorder %s3361_s14, 0 }
  0xf9   : > { %s3377_s28 = sld [smem:[#allocation31_spill]] (!%p3376_p2)  ;;  %s3378_s11 = sld [smem:[#allocation38_spill]] (!%p3376_p2) }
  0xfa   : > { %1877 = dma.hbm_to_vmem [thread:$0]  (!%p3375_p6), %s2936_s25, 128, %s435_s26, %s403_s7  }
  0xfb   : > { %443 = sbr.rel (%p3376_p2) target bundleno = 2928 (0xb70), region = 48 }
  0xff   : > { %s2962_s30 = sand.u32 (!%p3376_p2), 1, %s3377_s28   ;;  %p3379_p9 = scmp.ne.s32.totalorder (!%p3376_p2), %s3378_s11, 0 }
 0x100   : > { %s2965_s9 = sshll.u32 (!%p3376_p2), %s2962_s30, 3  ;;  %s446_s10 = scalar_lea.sflag (!%p3376_p2), [#allocation4], %s2962_s30 }
 0x101   : > { %s449_s12 = scalar_lea.vmem (!%p3376_p2), [#allocation3], %s2965_s9 }
 0x102   : > { %2364 = dma.done.wait (%p3379_p9), %s446_s10, 128  }
 0x103   : > { %2366 = vsyncadd (%p3379_p9), %s446_s10, 4294967168  ;;  %s3380_s7 = sld [smem:[#allocation35_spill]]  ;;  %s458_s14 = scalar_lea.vmem [#allocation6], %s2965_s9 }
 0x109   : > { %s454_s27 = sand.u32 1, %s3380_s7  }
 0x10a   : > { %s455_s23 = scalar_lea.sflag [#allocation7], %s454_s27 }
 0x10b   : > { %2368 = dma.done.wait (%p3379_p9), %s455_s23, 128  }
 0x10c   : > { %2370 = vsyncadd (%p3379_p9), %s455_s23, 4294967168  ;;  %s3381_s25 = sld [smem:[#allocation28_spill]]  ;;  %s3382_s19 = sld [smem:[#allocation41_spill]] }
 0x112   : > { %s465_s26 = sand.u32 1, %s3381_s25   ;;  %p3383_p12 = scmp.ne.s32.totalorder %s3382_s19, 0 }
 0x113   : > { %s2980_s20 = sshll.u32 %s465_s26, 4 }
 0x114   : > { %s467_s18 = scalar_lea.vmem [#allocation8], %s2980_s20 }
 0x115   : > { %2372 = dma.done.wait (%p3383_p12), %s455_s23, 256  }
 0x116   : > { %2374 = vsyncadd (%p3383_p12), %s455_s23, 4294967040  ;;  %s473_s22 = scalar_lea.sflag [#allocation10], %s454_s27  ;;  %s476_s21 = scalar_lea.vmem [#allocation9], %s2980_s20 }
 0x117   : > { %2376 = dma.done.wait (%p3383_p12), %s473_s22, 512  }
 0x118   : > { %2378 = vsyncadd (%p3383_p12), %s473_s22, 4294966784  ;;  %s1686_s15 = sshll.u32 %s465_s26, 5  ;;  %s485_s29 = scalar_lea.vmem [#allocation11], %s2980_s20 }
 0x119   : > { %s491_s24 = scalar_lea.sflag [#allocation13], %s454_s27  ;;  %s2993_s3 = scalar_lea.vmem [#allocation12], %s1686_s15 }
 0x11a   : > { %2380 = dma.done.wait (%p3383_p12), %s491_s24, 640  }
 0x11b   : > { %2382 = vsyncadd (%p3383_p12), %s491_s24, 4294966656  ;;  %s3384_s1 = sld [smem:[#allocation26_spill]]  ;;  %s1687_s8 = sshll.u32 %s465_s26, 3 }
 0x11c   : > { %s3004_s10 = scalar_lea.vmem [#allocation14], %s1687_s8  ;;  %s3007_s7 = scalar_lea.vmem [#allocation15], %s2965_s9 }
 0x11d   : > { %s3385_s23 = sld [smem:[#allocation32_spill]] }
 0x121   : > { %s568_s28 = sand.u32 1, %s3384_s1  }
 0x122   : > { %s3002_s11 = sshll.u32 %s568_s28, 3 }
 0x123   : > { %s570_s27 = scalar_lea.vmem [#allocation16], %s3002_s11  ;;  %p1690_p3 = scmp.ne.s32.totalorder %s3385_s23, 0 }
 0x124   : > { %v576_v0 = vld [vmem:[%s449_s12] sm:$0xff] (!%p1690_p3)  ;;  %vm577_vm0 = vcmask (!%p1690_p3), 261120  }
 0x125   : > { %575 = sbr.rel (%p1690_p3) target bundleno = 300 (0x12c), region = 80  ;;  %578 = vst.msk [vmem:[%s3007_s7] sm:$0xff] (!%p1690_p3), %vm577_vm0, %v576_v0 }
 0x12c PF: > { %v2011_v1 = vld [vmem:[%s467_s18] sm:$0xff]   ;;  %v2456_v2 = vmov 0.0   ;;  %v2012_v3 = vld [vmem:[%s467_s18 + $0x8] sm:$0xff]   ;;  %vm2457_vm1 = vmmov 0   ;;  %vm604_vm2 = vcmask 261120   ;;  %v588_v8 = vlaneseq  ;;  %s2458_s9 = smov 104  }
 0x12d   : > { %1754 = vmatprep.subr.bf16.mxu0 %v2456_v2  ;;  %1762 = vmatprep.subr.bf16.mxu1 %v2456_v2  ;;  %v579_v4 = vld [vmem:[%s3007_s7] sm:$0xff]  ;;  %v3036_v11 = vld [vmem:[%s3004_s10] sm:$0xff]  ;;  %s2459_s12 = smov 120   ;;  %s2461_s25 = smov 112   ;;  %vm658_vm3 = vcmask 64512   ;;  %vm912_vm4 = vcmask 1043456  }
 0x12e   : > { %1755 = vmatpush3.bf16.msra.mxu0 %v2011_v1  ;;  %1758 = vmatprep.mubr.msk.bf16.mxu0 %vm2457_vm1, %v2456_v2  ;;  %v580_v5 = vld [vmem:[%s458_s14] sm:$0xff]  ;;  %v3032_v9 = vshrl.u32 %v588_v8, 7  ;;  %s2460_s14 = smov 96   ;;  %s2462_s19 = smov 64   ;;  %vm1105_vm5 = vcmask 130112   ;;  %vm1111_vm6 = vcmask 195712  }
 0x12f   : > { %1756 = vmatprep.subr.bf16.mxu0 %v2456_v2  ;;  %v3022_v6 = vadd.f32 %v580_v5, %v579_v4  ;;  %1764 = vmatprep.mubr.msk.bf16.mxu1 %vm2457_vm1, %v2456_v2  ;;  %s2463_s26 = smov 8   ;;  %s2464_s18 = smov 16   ;;  %vm1117_vm7 = vcmask 261312   ;;  %vm1311_vm8 = vcmask 523264  }
 0x130   : > { %v590_v10 = vsub.s32 0, %v3032_v9  ;;  %s2465_s22 = smov 24   ;;  %s3386_s20 = sld [smem:[#allocation32_spill]] }
 0x131   : > { %v583_v7 = vpack.c.bf16 %v3022_v6, %v3022_v6  ;;  %s1414_s8 = sshll.u32 %s570_s27, 4  ;;  %s1415_s8 = int_to_ptr.vmem [resolvable:$true] %s1414_s8 }
 0x132   : > { %1757 = vmatpush3.bf16.msra.mxu0 %v2012_v3  ;;  %v591_v12 = vrot.slane %v3036_v11, %v590_v10 }
 0x133   : > { %1768 = vmatprep.subr.bf16.mxu0 %v2456_v2 }
 0x135   : > { %1759 = vmatmul.mubr.msk.bf16.vlgmr.msra.gmra.mrb[0].mxu0 %vm604_vm2, %v583_v7 }
 0x136   : > { %1770 = vmatprep.mubr.msk.bf16.mxu0 %vm2457_vm1, %v2456_v2  ;;  %s1716_s24 = sshll.u32 %s3386_s20, 1 }
 0x208   : > { %v642_v13 = vpop.f32.mrb[0].mxu0 }
 0x209   : > { %v643_v14 = vadd.f32 %v642_v13, %v591_v12  ;;  %v1760_v15 = vpop.f32.mrb[1].mxu0 }
 0x20a   : > { %v645_v16 = vpop.f32.mrb[2].mxu0 }
 0x20b   : > { %v3039_v17 = vpack.c.bf16 %v643_v14, %v643_v14  ;;  %v1761_v18 = vpop.f32.mrb[3].mxu0 }
 0x20d   : > { %654 = vrot.lane.b32.xlu1 %v3039_v17, %s2458_s9  ;;  %650 = vrot.lane.b32.xlu0 %v3039_v17, %s2459_s12  ;;  %s3390_s9 = sld [smem:[#allocation50_spill]] }
 0x211   : > { %656 = vrot.lane.b32.xlu1 %v3039_v17, %s2460_s14  ;;  %652 = vrot.lane.b32.xlu0 %v3039_v17, %s2461_s25 }
 0x213   : > { %s3391_s25 = smov %s3390_s9 }
 0x27f   : > { %v3045_v19 = vpop.permute.xlu1 %654  ;;  %v651_v20 = vpop.permute.xlu0 %650 }
 0x280   : > { %705 = vrot.lane.b32.xlu0 %v651_v20, %s2460_s14 }
 0x283   : > { %v657_v21 = vpop.permute.xlu1 %656  ;;  %v3047_v22 = vpop.permute.xlu0 %652 }
 0x284   : > { %801 = vrot.lane.b32.xlu0 %v3045_v19, %s2460_s14  ;;  %753 = vrot.lane.b32.xlu1 %v3047_v22, %s2460_s14  ;;  %v663_v23 = vsel %vm658_vm3, %v657_v21, 0  ;;  %s1386_s14 = scalar_lea.sflag [#allocation17], %s568_s28 }
 0x285   : > { %1763 = vmatpush3.bf16.xpose.msra.mxu1 %v663_v23 }
 0x286   : > { %1774 = vmatprep.subr.bf16.mxu1 %v2456_v2 }
 0x28c   : > { %1765 = vmatmul.mubr.msk.bf16.vlgmr.msra.gmra.mrb[0].mxu1 %vm658_vm3, %v3039_v17 }
 0x28d   : > { %1776 = vmatprep.mubr.msk.bf16.mxu1 %vm2457_vm1, %v2456_v2 }
 0x2f2   : > { %v706_v24 = vpop.permute.xlu0 %705 }
 0x2f3   : > { %v711_v25 = vsel %vm658_vm3, %v706_v24, 0 }
 0x2f4   : > { %1769 = vmatpush3.bf16.xpose.msra.mxu0 %v711_v25 }
 0x2f5   : > { %1780 = vmatprep.subr.bf16.mxu0 %v2456_v2 }
 0x2f6   : > { %v754_v26 = vpop.permute.xlu1 %753  ;;  %v802_v28 = vpop.permute.xlu0 %801 }
 0x2f7   : > { %v759_v27 = vsel %vm658_vm3, %v754_v26, 0  ;;  %v807_v29 = vsel %vm658_vm3, %v802_v28, 0 }
 0x2f8   : > { %1775 = vmatpush3.bf16.xpose.msra.mxu1 %v759_v27 }
 0x2f9   : > { %1786 = vmatprep.subr.bf16.mxu1 %v2456_v2 }
 0x2fb   : > { %1771 = vmatmul.mubr.msk.bf16.vlgmr.msra.gmra.mrb[4].mxu0 %vm658_vm3, %v651_v20 }
 0x2fc   : > { %1781 = vmatpush3.bf16.xpose.msra.mxu0 %v807_v29  ;;  %1782 = vmatprep.mubr.msk.bf16.mxu0 %vm2457_vm1, %v2456_v2 }
 0x2fd   : > { %1792 = vmatprep.subr.bf16.mxu0 %v2456_v2 }
 0x2ff   : > { %1777 = vmatmul.mubr.msk.bf16.vlgmr.msra.gmra.mrb[4].mxu1 %vm658_vm3, %v3047_v22 }
 0x300   : > { %1788 = vmatprep.mubr.msk.bf16.mxu1 %vm2457_vm1, %v2456_v2 }
 0x303   : > { %1783 = vmatmul.mubr.msk.bf16.vlgmr.msra.gmra.mrb[8].mxu0 %vm658_vm3, %v3045_v19 }
 0x304   : > { %1794 = vmatprep.mubr.msk.bf16.mxu0 %vm2457_vm1, %v2456_v2 }
 0x35f   : > { %v699_v30 = vpop.f32.mrb[0].mxu1 }
 0x360   : > { %v1766_v31 = vpop.f32.mrb[1].mxu1  ;;  %v849_v32 = vsel %vm658_vm3, %v699_v30, -inf }
 0x361   : > { %v702_v33 = vpop.f32.mrb[2].mxu1  ;;  %850 = vmax.xlane.f32.xlu1 %v849_v32 }
 0x362   : > { %v1767_v34 = vpop.f32.mrb[3].mxu1 }
 0x3ce   : > { %v747_v35 = vpop.f32.mrb[4].mxu0 }
 0x3cf   : > { %v1772_v36 = vpop.f32.mrb[5].mxu0  ;;  %v852_v37 = vsel %vm658_vm3, %v747_v35, -inf }
 0x3d0   : > { %853 = vmax.xlane.f32.xlu0 %v852_v37  ;;  %v750_v38 = vpop.f32.mrb[6].mxu0 }
 0x3d1   : > { %v1773_v39 = vpop.f32.mrb[7].mxu0 }
 0x3d2   : > { %v795_v40 = vpop.f32.mrb[4].mxu1 }
 0x3d3   : > { %v1778_v41 = vpop.f32.mrb[5].mxu1  ;;  %v855_v42 = vsel %vm658_vm3, %v795_v40, -inf }
 0x3d4   : > { %v798_v43 = vpop.f32.mrb[6].mxu1  ;;  %856 = vmax.xlane.f32.xlu0 %v855_v42 }
 0x3d5   : > { %v1779_v44 = vpop.f32.mrb[7].mxu1 }
 0x3d6   : > { %v843_v45 = vpop.f32.mrb[8].mxu0 }
 0x3d7   : > { %v1784_v46 = vpop.f32.mrb[9].mxu0  ;;  %v858_v47 = vsel %vm658_vm3, %v843_v45, -inf }
 0x3d8   : > { %859 = vmax.xlane.f32.xlu1 %v858_v47  ;;  %v846_v48 = vpop.f32.mrb[10].mxu0  ;;  %v2013_v46 = vld [vmem:[%s476_s21] sm:$0xff]   ;;  %v2014_v47 = vld [vmem:[%s476_s21 + $0x8] sm:$0xff]   ;;  %s3387_s21 = sld [smem:[#allocation33_spill]] }
 0x3d9   : > { %v1785_v49 = vpop.f32.mrb[11].mxu0 }
 0x3e9   : > { %956 = vrot.lane.b32.xlu1 %v651_v20, %s2462_s19 }
 0x3ea   : > { %907 = vrot.lane.b32.xlu0 %v3039_v17, %s2462_s19 }
 0x3ee   : > { %v851_v50 = vpop.xlane.xlu1 %850 }
 0x3ef   : > { %v861_v51 = vsub.f32 %v699_v30, %v851_v50 }
 0x3f1   : > { %v865_v52 = vmul.f32 1.442695, %v861_v51 }
 0x3f3   : > { %2021 = vpow2.f32 %v865_v52 }
 0x3fd   : > { %v2022_v53 = vpop.eup %2021 }
 0x3fe   : > { %v873_v54 = vsel %vm658_vm3, %v2022_v53, 0.0 }
 0x409   : > { %874 = vadd.xlane.f32.xlu0 %v873_v54 }
 0x45d   : > { %v854_v55 = vpop.xlane.xlu0 %853 }
 0x45e   : > { %v862_v56 = vsub.f32 %v747_v35, %v854_v55 }
 0x460   : > { %v867_v57 = vmul.f32 1.442695, %v862_v56 }
 0x461   : > { %v857_v58 = vpop.xlane.xlu0 %856 }
 0x462   : > { %2023 = vpow2.f32 %v867_v57  ;;  %v863_v59 = vsub.f32 %v795_v40, %v857_v58 }
 0x464   : > { %v869_v60 = vmul.f32 1.442695, %v863_v59 }
 0x465   : > { %v908_v61 = vpop.permute.xlu0 %907  ;;  %v860_v62 = vpop.xlane.xlu1 %859 }
 0x466   : > { %2025 = vpow2.f32 %v869_v60  ;;  %v914_v63 = vsel %vm912_vm4, %v908_v61, 0  ;;  %v864_v0 = vsub.f32 %v843_v45, %v860_v62 }
 0x467   : > { %1787 = vmatpush3.bf16.msra.mxu1 %v914_v63 }
 0x468   : > { %v871_v1 = vmul.f32 1.442695, %v864_v0  ;;  %1798 = vmatprep.subr.bf16.mxu1 %v2456_v2 }
 0x469   : > { %v957_v3 = vpop.permute.xlu1 %956 }
 0x46a   : > { %2027 = vpow2.f32 %v871_v1  ;;  %v962_v4 = vsel %vm912_vm4, %v957_v3, 0  ;;  %v1127_v1 = vsub.s32 1, %v3032_v9 }
 0x46b   : > { %1793 = vmatpush3.bf16.msra.mxu0 %v962_v4 }
 0x46c   : > { %v2024_v5 = vpop.eup %2023  ;;  %1804 = vmatprep.subr.bf16.mxu0 %v2456_v2  ;;  %v1128_v3 = vrot.slane %v3036_v11, %v1127_v1 }
 0x46d   : > { %v876_v7 = vsel %vm658_vm3, %v2024_v5, 0.0 }
 0x46e   : > { %877 = vadd.xlane.f32.xlu1 %v876_v7 }
 0x470   : > { %v2026_v8 = vpop.eup %2025 }
 0x471   : > { %v879_v10 = vsel %vm658_vm3, %v2026_v8, 0.0 }
 0x472   : > { %880 = vadd.xlane.f32.xlu0 %v879_v10 }
 0x474   : > { %v2028_v12 = vpop.eup %2027 }
 0x475   : > { %v882_v13 = vsel %vm658_vm3, %v2028_v12, 0.0 }
 0x476   : > { %883 = vadd.xlane.f32.xlu1 %v882_v13 }
 0x487   : > { %1004 = vrot.lane.b32.xlu1 %v3047_v22, %s2462_s19 }
 0x488   : > { %1052 = vrot.lane.b32.xlu0 %v3045_v19, %s2462_s19  ;;  %s2251_s19 = scalar_lea.vmem %s1415_s8, 128 }
 0x489   : > { %p2252_p11 = scmp.ne.s32.totalorder %s1415_s8, %s2251_s19 }
 0x496   : > { %v875_v14 = vpop.xlane.xlu0 %874 }
 0x497   : > { %2029 = vrcp.f32 %v875_v14 }
 0x4a1   : > { %v2030_v15 = vpop.eup %2029 }
 0x4a2   : > { %v889_v16 = vmul.f32 %v2030_v15, %v2022_v53 }
 0x4a4   : > { %v903_v17 = vpack.c.bf16 %v889_v16, %v889_v16  ;;  %v893_v32 = vsel %vm658_vm3, %v889_v16, 0.0 }
 0x4a6   : > { %1789 = vmatmul.mubr.msk.bf16.vlgmr.msra.gmra.mrb[8].mxu1 %vm658_vm3, %v903_v17 }
 0x4a7   : > { %1800 = vmatprep.mubr.msk.bf16.mxu1 %vm2457_vm1, %v2456_v2 }
 0x4fb   : > { %v878_v18 = vpop.xlane.xlu1 %877 }
 0x4fc   : > { %2031 = vrcp.f32 %v878_v18 }
 0x4ff   : > { %v881_v20 = vpop.xlane.xlu0 %880 }
 0x500   : > { %2033 = vrcp.f32 %v881_v20  ;;  %v2015_v20 = vld [vmem:[%s485_s29] sm:$0xff]  }
 0x503   : > { %v884_v21 = vpop.xlane.xlu1 %883  ;;  %v1053_v19 = vpop.permute.xlu0 %1052 }
 0x504   : > { %2035 = vrcp.f32 %v884_v21  ;;  %v1058_v29 = vsel %vm912_vm4, %v1053_v19, 0  ;;  %v2016_v21 = vld [vmem:[%s485_s29 + $0x8] sm:$0xff]   ;;  %s3389_s29 = sld [smem:[#allocation45_spill]] }
 0x506   : > { %v2032_v22 = vpop.eup %2031 }
 0x507   : > { %v890_v23 = vmul.f32 %v2032_v22, %v2024_v5  ;;  %v1005_v24 = vpop.permute.xlu1 %1004  ;;  %v2018_v22 = vld [vmem:[%s2993_s3 + $0x8] sm:$0xff]  }
 0x508   : > { %v1010_v25 = vsel %vm912_vm4, %v1005_v24, 0 }
 0x509   : > { %1799 = vmatpush3.bf16.msra.mxu1 %v1010_v25  ;;  %v904_v26 = vpack.c.bf16 %v890_v23, %v890_v23  ;;  %v894_v30 = vsel %vm658_vm3, %v890_v23, 0.0  ;;  %v1201_v25 = vsub.s32 4, %v3032_v9 }
 0x50a   : > { %v2034_v27 = vpop.eup %2033  ;;  %1810 = vmatprep.subr.bf16.mxu1 %v2456_v2  ;;  %v895_v35 = vadd.f32 %v894_v30, %v893_v32  ;;  %p3392_p13 = scmp.ne.s32.totalorder %s3389_s29, 0 }
 0x50b   : > { %v891_v28 = vmul.f32 %v2034_v27, %v2026_v8  ;;  %1795 = vmatmul.mubr.msk.bf16.vlgmr.msra.gmra.mrb[12].mxu0 %vm658_vm3, %v904_v26  ;;  %v1206_v26 = vsub.s32 5, %v3032_v9  ;;  %v1202_v27 = vrot.slane %v3036_v11, %v1201_v25 }
 0x50c   : > { %1805 = vmatpush3.bf16.msra.mxu0 %v1058_v29  ;;  %1806 = vmatprep.mubr.msk.bf16.mxu0 %vm2457_vm1, %v2456_v2  ;;  %p2253_p4 = pnand %p2252_p11, %p3392_p13 }
 0x50d   : > { %v905_v31 = vpack.c.bf16 %v891_v28, %v891_v28  ;;  %1818 = vmatprep.subr.bf16.mxu0 %v2456_v2  ;;  %v896_v33 = vsel %vm658_vm3, %v891_v28, 0.0  ;;  %v1207_v30 = vrot.slane %v3036_v11, %v1206_v26 }
 0x50e   : > { %v2036_v34 = vpop.eup %2035  ;;  %v897_v37 = vadd.f32 %v896_v33, %v895_v35  ;;  %v2020_v35 = vld [vmem:[%s2993_s3 + $0x18] sm:$0xff]   ;;  %p2254_p5 = pneg %p2253_p4 }
 0x50f   : > { %v892_v36 = vmul.f32 %v2036_v34, %v2028_v12  ;;  %1801 = vmatmul.mubr.msk.bf16.vlgmr.msra.gmra.mrb[12].mxu1 %vm658_vm3, %v905_v31  ;;  %v2019_v34 = vld [vmem:[%s2993_s3 + $0x10] sm:$0xff]  }
 0x510   : > { %1814 = vmatprep.mubr.msk.bf16.mxu1 %vm2457_vm1, %v2456_v2  ;;  %1811 = vmatpush3.bf16.msra.mxu1 %v2013_v46 }
 0x511   : > { %v906_v38 = vpack.c.bf16 %v892_v36, %v892_v36  ;;  %v898_v39 = vsel %vm658_vm3, %v892_v36, 0.0  ;;  %1812 = vmatprep.subr.bf16.mxu1 %v2456_v2  ;;  %v1216_v36 = vsub.s32 2, %v3032_v9 }
 0x512   : > { %v899_v40 = vadd.f32 %v898_v39, %v897_v37 }
 0x513   : > { %1807 = vmatmul.mubr.msk.bf16.vlgmr.msra.gmra.mrb[16].mxu0 %vm658_vm3, %v906_v38  ;;  %v1217_v37 = vrot.slane %v3036_v11, %v1216_v36 }
 0x514   : > { %1822 = vmatprep.mubr.msk.bf16.mxu0 %vm2457_vm1, %v2456_v2  ;;  %v901_v41 = vmul.f32 0.25, %v899_v40  ;;  %1813 = vmatpush3.bf16.msra.mxu1 %v2014_v47 }
 0x515   : > { %1826 = vmatprep.subr.bf16.mxu1 %v2456_v2  ;;  %1819 = vmatpush3.bf16.msra.mxu0 %v2015_v20 }
 0x516   : > { %902 = vst.msk [vmem:[%s570_s27] sm:$0xff] %vm658_vm3, %v901_v41  ;;  %1820 = vmatprep.subr.bf16.mxu0 %v2456_v2 }
 0x519   : > { %1821 = vmatpush3.bf16.msra.mxu0 %v2016_v21 }
 0x579   : > { %v950_v42 = vpop.f32.mrb[8].mxu1 }
 0x57a   : > { %1100 = vst.msk [vmem:[#allocation2] sm:$0xff] %vm658_vm3, %v950_v42  ;;  %v1790_v43 = vpop.f32.mrb[9].mxu1 }
 0x57b   : > { %v953_v44 = vpop.f32.mrb[10].mxu1 }
 0x57c   : > { %v1791_v45 = vpop.f32.mrb[11].mxu1 }
 0x57d   : > { %v1285_v45 = vsub.s32 3, %v3032_v9 }
 0x5de   : > { %v998_v48 = vpop.f32.mrb[12].mxu0 }
 0x5df   : > { %1102 = vrot.lane.b32.xlu1 %v998_v48, %s2463_s26  ;;  %v1796_v49 = vpop.f32.mrb[13].mxu0  ;;  %s2466_s26 = smov [#allocation16]  }
 0x5e0   : > { %v1001_v50 = vpop.f32.mrb[14].mxu0 }
 0x5e1   : > { %v1797_v51 = vpop.f32.mrb[15].mxu0 }
 0x5e2   : > { %v1046_v52 = vpop.f32.mrb[12].mxu1 }
 0x5e3   : > { %1108 = vrot.lane.b32.xlu0 %v1046_v52, %s2464_s18  ;;  %v1802_v53 = vpop.f32.mrb[13].mxu1  ;;  %s2255_s18 = sshll.u32 %s2466_s26, 4  ;;  %s2256_s18 = int_to_ptr.vmem [resolvable:$false] %s2255_s18 }
 0x5e4   : > { %v1049_v54 = vpop.f32.mrb[14].mxu1  ;;  %p2258_p10 = scmp.lt.s32.totalorder %s1415_s8, %s2256_s18 }
 0x5e5   : > { %v1803_v55 = vpop.f32.mrb[15].mxu1 }
 0x5e6   : > { %v1094_v56 = vpop.f32.mrb[16].mxu0 }
 0x5e7   : > { %1114 = vrot.lane.b32.xlu1 %v1094_v56, %s2465_s22  ;;  %v1808_v57 = vpop.f32.mrb[17].mxu0  ;;  %s2257_s22 = scalar_lea.vmem %s2256_s18, 256 }
 0x5e8   : > { %v1097_v58 = vpop.f32.mrb[18].mxu0  ;;  %p2259_p7 = scmp.lt.s32.totalorder %s2257_s22, %s2251_s19 }
 0x5e9   : > { %v1809_v59 = vpop.f32.mrb[19].mxu0 }
 0x5ea   : > { %p2260_p0 = por %p2259_p7, %p2258_p10 }
 0x5ec   : > { %p2261_p8 = pnand %p2260_p0, %p2254_p5 }
 0x651   : > { %v1103_v60 = vpop.permute.xlu1 %1102 }
 0x652   : > { %1106 = vst.msk [vmem:[#allocation2] sm:$0xff] %vm1105_vm5, %v1103_v60 }
 0x655   : > { %v1109_v61 = vpop.permute.xlu0 %1108 }
 0x656   : > { %1112 = vst.msk [vmem:[#allocation2] sm:$0xff] %vm1111_vm6, %v1109_v61 }
 0x659   : > { %v1115_v62 = vpop.permute.xlu1 %1114 }
 0x65a   : > { %1118 = vst.msk [vmem:[#allocation2] sm:$0xff] %vm1117_vm7, %v1115_v62 }
 0x661   : > { %v1119_v63 = vld [vmem:[#allocation2] sm:$0xff] }
 0x662   : > { %v1120_v0 = vpack.c.bf16 %v1119_v63, %v1119_v63 }
 0x664   : > { %1815 = vmatmul.mubr.msk.bf16.vlgmr.msra.gmra.mrb[16].mxu1 %vm604_vm2, %v1120_v0 }
 0x665   : > { %1834 = vmatprep.mubr.msk.bf16.mxu1 %vm2457_vm1, %v2456_v2 }
 0x737   : > { %v1178_v4 = vpop.f32.mrb[16].mxu1 }
 0x738   : > { %v1179_v5 = vadd.f32 %v1178_v4, %v1128_v3  ;;  %v1816_v7 = vpop.f32.mrb[17].mxu1 }
 0x739   : > { %v1181_v8 = vpop.f32.mrb[18].mxu1 }
 0x73a   : > { %v1817_v10 = vpop.f32.mrb[19].mxu1  ;;  %v1184_v12 = vadd.f32 %v1179_v5, %v3022_v6  ;;  %v2017_v6 = vld [vmem:[%s2993_s3] sm:$0xff]   ;;  %s1410_s3 = sadd.s32 %s3387_s21, %s1716_s24 }
 0x73b   : > { %1827 = vmatpush3.bf16.msra.mxu1 %v2017_v6  ;;  %s1717_s1 = sshll.u32 %s1410_s3, 7 }
 0x73c   : > { %v1185_v13 = vsel %vm604_vm2, %v1184_v12, 0.0  ;;  %1828 = vmatprep.subr.bf16.mxu1 %v2456_v2  ;;  %s3161_s12 = scalar_lea.hbm %s3390_s9, %s1717_s1 }
 0x73d   : > { %1186 = vadd.xlane.f32.xlu0 %v1185_v13 }
 0x73f   : > { %1829 = vmatpush3.bf16.msra.mxu1 %v2018_v22 }
 0x740   : > { %1830 = vmatprep.subr.bf16.mxu1 %v2456_v2 }
 0x743   : > { %1831 = vmatpush3.bf16.msra.mxu1 %v2019_v34 }
 0x744   : > { %1832 = vmatprep.subr.bf16.mxu1 %v2456_v2  ;;  %v1286_v2 = vrot.slane %v3036_v11, %v1285_v45 }
 0x747   : > { %1833 = vmatpush3.bf16.msra.mxu1 %v2020_v35 }
 0x7ca   : > { %v1187_v14 = vpop.xlane.xlu0 %1186 }
 0x7cb   : > { %v1189_v15 = vmul.f32 0.03125, %v1187_v14 }
 0x7cd   : > { %v1190_v16 = vsub.f32 %v1184_v12, %v1189_v15 }
 0x7cf   : > { %v1191_v17 = vmul.f32 %v1190_v16, %v1190_v16 }
 0x7d1   : > { %v1192_v18 = vsel %vm604_vm2, %v1191_v17, 0.0 }
 0x7d2   : > { %1193 = vadd.xlane.f32.xlu1 %v1192_v18 }
 0x85f   : > { %v1194_v23 = vpop.xlane.xlu1 %1193 }
 0x860   : > { %v1195_v24 = vmul.f32 0.03125, %v1194_v23 }
 0x862   : > { %v1196_v19 = vadd.f32 1e-05, %v1195_v24 }
 0x864   : > { %2037 = vrsqrt.f32 %v1196_v19 }
 0x86e   : > { %v2038_v28 = vpop.eup %2037 }
 0x86f   : > { %v1198_v29 = vmul.f32 %v2038_v28, %v1190_v16 }
 0x871   : > { %v1203_v31 = vmul.f32 %v1202_v27, %v1198_v29 }
 0x873   : > { %v1208_v32 = vadd.f32 %v1207_v30, %v1203_v31 }
 0x875   : > { %v1209_v33 = vpack.c.bf16 %v1208_v32, %v1208_v32 }
 0x877   : > { %1823 = vmatmul.mubr.msk.bf16.vlgmr.msra.gmra.mrb[20].mxu0 %vm604_vm2, %v1209_v33 }
 0x94a   : > { %v1267_v38 = vpop.f32.mrb[20].mxu0 }
 0x94b   : > { %v1268_v39 = vadd.f32 %v1267_v38, %v1217_v37  ;;  %v1824_v40 = vpop.f32.mrb[21].mxu0 }
 0x94c   : > { %v1270_v41 = vpop.f32.mrb[22].mxu0 }
 0x94d   : > { %v1273_v42 = vmax.f32 %v1268_v39, 0.0  ;;  %v1825_v43 = vpop.f32.mrb[23].mxu0 }
 0x94f   : > { %v1274_v44 = vpack.c.bf16 %v1273_v42, %v1273_v42 }
 0x951   : > { %1835 = vmatmul.mubr.msk.bf16.vlgmr.msra.gmra.mrb[20].mxu1 %vm1311_vm8, %v1274_v44 }
 0xa24   : > { %v1349_v46 = vpop.f32.mrb[20].mxu1 }
 0xa25   : > { %v1350_v47 = vadd.f32 %v1349_v46, %v1286_v2  ;;  %v1836_v48 = vpop.f32.mrb[21].mxu1 }
 0xa26   : > { %v1352_v49 = vpop.f32.mrb[22].mxu1 }
 0xa27   : > { %v1837_v50 = vpop.f32.mrb[23].mxu1  ;;  %v1355_v51 = vadd.f32 %v1350_v47, %v1208_v32 }
 0xa29   : > { %v1356_v52 = vsel %vm604_vm2, %v1355_v51, 0.0 }
 0xa2a   : > { %1357 = vadd.xlane.f32.xlu0 %v1356_v52 }
 0xab7   : > { %v1358_v53 = vpop.xlane.xlu0 %1357 }
 0xab8   : > { %v1359_v54 = vmul.f32 0.03125, %v1358_v53 }
 0xaba   : > { %v1360_v55 = vsub.f32 %v1355_v51, %v1359_v54 }
 0xabc   : > { %v1361_v56 = vmul.f32 %v1360_v55, %v1360_v55 }
 0xabe   : > { %v1362_v57 = vsel %vm604_vm2, %v1361_v56, 0.0 }
 0xabf   : > { %1363 = vadd.xlane.f32.xlu0 %v1362_v57 }
 0xac0   : > { %2264 = shalt.err (!%p2261_p8)
}
 0xac1   : > { %s2265_s28 = scalar_lea.hbm %s3161_s12, 128  ;;  %s2269_s20 = scalar_lea.hbm %s3391_s25, 512 }
 0xac2   : > { %p2266_p1 = scmp.ne.s32.totalorder %s3161_s12, %s2265_s28  ;;  %p2270_p9 = scmp.lt.u32.totalorder %s3161_s12, %s3391_s25 }
 0xac3   : > { %p2271_p12 = scmp.lt.u32.totalorder %s2269_s20, %s2265_s28  ;;  %p2273_p11 = scmp.lt.u32.totalorder %s2265_s28, %s3161_s12 }
 0xac4   : > { %p2267_p6 = pnand %p2266_p1, %p3392_p13 }
 0xac5   : > { %p2272_p3 = por %p2271_p12, %p2270_p9 }
 0xac6   : > { %p2268_p2 = pneg %p2267_p6 }
 0xac7   : > { %p2274_p4 = por %p2273_p11, %p2272_p3 }
 0xac9   : > { %p2275_p5 = pnand %p2274_p4, %p2268_p2 }
 0xacb   : > { %2278 = shalt.err (!%p2275_p5)
}
 0xacc   : > { %1853 = dma.vmem_to_hbm [thread:$0]  (%p3392_p13), %s1415_s8, 128, %s3161_s12, %s1386_s14   ;;  %v1371_v61 = vsub.s32 6, %v3032_v9  ;;  %v1376_v62 = vsub.s32 7, %v3032_v9 }
 0xacd   : > { %s3393_s3 = sld [smem:[#allocation42_spill]]  ;;  %s1715_s29 = sshll.u32 %s3387_s21, 7 }
 0xace   : > { %v1372_v63 = vrot.slane %v3036_v11, %v1371_v61  ;;  %v1377_v3 = vrot.slane %v3036_v11, %v1376_v62  ;;  %s1399_s1 = sshll.u32 %s3007_s7, 4  ;;  %s3394_s23 = sld [smem:[#allocation49_spill]]  ;;  %s3193_s1 = int_to_ptr.vmem [resolvable:$true] %s1399_s1 }
 0xacf   : > { %s1381_s12 = scalar_lea.sflag [#allocation5], %s2962_s30  ;;  %s2279_s14 = scalar_lea.vmem %s3193_s1, 128 }
 0xad0   : > { %p2280_p13 = scmp.ne.s32.totalorder %s3193_s1, %s2279_s14  ;;  %s2467_s21 = smov [#allocation15]  }
 0xad1   : > { %s2283_s19 = sshll.u32 %s2467_s21, 4  ;;  %s2284_s19 = int_to_ptr.vmem [resolvable:$false] %s2283_s19 }
 0xad2   : > { %s2285_s26 = scalar_lea.vmem %s2284_s19, 256  ;;  %p2286_p8 = scmp.lt.s32.totalorder %s3193_s1, %s2284_s19 }
 0xad3   : > { %p3395_p10 = scmp.ne.s32.totalorder %s3393_s3, 0  ;;  %p2287_p1 = scmp.lt.s32.totalorder %s2285_s26, %s2279_s14 }
 0xad4   : > { %s3191_s9 = scalar_lea.hbm %s3394_s23, %s1715_s29 }
 0xad5   : > { %p2281_p7 = pnand %p2280_p13, %p3395_p10  ;;  %p2288_p6 = por %p2287_p1, %p2286_p8 }
 0xad7   : > { %p2282_p0 = pneg %p2281_p7 }
 0xad9   : > { %p2289_p2 = pnand %p2288_p6, %p2282_p0 }
 0xb4c   : > { %v1364_v58 = vpop.xlane.xlu0 %1363 }
 0xb4d   : > { %v1365_v59 = vmul.f32 0.03125, %v1364_v58 }
 0xb4f   : > { %v1366_v60 = vadd.f32 1e-05, %v1365_v59 }
 0xb51   : > { %2039 = vrsqrt.f32 %v1366_v60 }
 0xb5b   : > { %v2040_v0 = vpop.eup %2039 }
 0xb5c   : > { %v1368_v1 = vmul.f32 %v2040_v0, %v1360_v55 }
 0xb5e   : > { %v1373_v4 = vmul.f32 %v1372_v63, %v1368_v1 }
 0xb60   : > { %v1378_v5 = vadd.f32 %v1377_v3, %v1373_v4 }
 0xb62   : > { %1379 = vst.msk [vmem:[%s3007_s7] sm:$0xff] %vm604_vm2, %v1378_v5 }
 0xb63   : > { %2292 = shalt.err (!%p2289_p2)
}
 0xb64   : > { %s2293_s30 = scalar_lea.hbm %s3191_s9, 128  ;;  %s2297_s22 = scalar_lea.hbm %s3394_s23, 256 }
 0xb65   : > { %p2294_p9 = scmp.ne.s32.totalorder %s3191_s9, %s2293_s30  ;;  %p2298_p11 = scmp.lt.u32.totalorder %s3191_s9, %s3394_s23 }
 0xb66   : > { %p2299_p4 = scmp.lt.u32.totalorder %s2297_s22, %s2293_s30  ;;  %p2301_p13 = scmp.lt.u32.totalorder %s2293_s30, %s3191_s9 }
 0xb67   : > { %p2295_p12 = pnand %p2294_p9, %p3395_p10 }
 0xb68   : > { %p2300_p5 = por %p2299_p4, %p2298_p11 }
 0xb69   : > { %p2296_p3 = pneg %p2295_p12 }
 0xb6a   : > { %p2302_p7 = por %p2301_p13, %p2300_p5 }
 0xb6c   : > { %p2303_p0 = pnand %p2302_p7, %p2296_p3 }
 0xb6e   : > { %2306 = shalt.err (!%p2303_p0)
}
 0xb6f   : > { %1852 = dma.vmem_to_hbm [thread:$0]  (%p3395_p10), %s3193_s1, 128, %s3191_s9, %s1381_s12  }
 0xb70 PF: > { %s3396_s27 = sld [smem:[#allocation34_spill]]  ;;  %s3397_s20 = sld [smem:[#allocation30_spill]] }
 0xb71   : > { %s3398_s15 = sld [smem:[#allocation43_spill]] }
 0xb76   : > { %p1886_p8 = scmp.ge.s32.totalorder %s3396_s27, 2  ;;  %s1426_s24 = sand.u32 1, %s3397_s20  }
 0xb77   : > { %p3399_p1 = scmp.ne.s32.totalorder %s3398_s15, 0  ;;  %s1427_s29 = scalar_lea.sflag [#allocation5], %s1426_s24 }
 0xb79   : > { %p1879_p6 = pnand %p1886_p8, %p3399_p1 }
 0xb7b   : > { %2384 = dma.done.wait (!%p1879_p6), %s1427_s29, 128  }
 0xb7c   : > { %2386 = vsyncadd (!%p1879_p6), %s1427_s29, 4294967168  ;;  %s3400_s8 = sld [smem:[#allocation25_spill]]  ;;  %s3401_s10 = sld [smem:[#allocation46_spill]] }
 0xb82   : > { %s1435_s14 = sand.u32 1, %s3400_s8   ;;  %p3402_p2 = scmp.ne.s32.totalorder %s3401_s10, 0 }
 0xb83   : > { %s1436_s3 = scalar_lea.sflag [#allocation17], %s1435_s14 }
 0xb84   : > { %p1882_p9 = pnand %p1886_p8, %p3402_p2 }
 0xb86   : > { %2388 = dma.done.wait (!%p1882_p9), %s1436_s3, 128  }
 0xb87   : > { %2390 = vsyncadd (!%p1882_p9), %s1436_s3, 4294967168  ;;  %s37_s18 = sadd.s32 1, %s3396_s27   ;;  %s3404_s27 = sld [smem:[#allocation26_spill]] }
 0xb88   : > { %p3227_p10 = scmp.ge.s32.totalorder %s37_s18, 6   ;;  %s3405_s28 = sld [smem:[#allocation27_spill]] }
 0xb89   : > { %s3406_s29 = sld [smem:[#allocation44_spill]]  ;;  %s3407_s30 = sld [smem:[#allocation28_spill]] }
 0xb8a   : > { %s3408_s9 = sld [smem:[#allocation29_spill]]  ;;  %s3409_s10 = sld [smem:[#allocation39_spill]] }
 0xb8b   : > { %s3410_s11 = sld [smem:[#allocation31_spill]]  ;;  %s3411_s21 = sld [smem:[#allocation40_spill]] }
 0xb8c   : > { %s3412_s19 = sld [smem:[#allocation36_spill]]  ;;  %s3413_s26 = sld [smem:[#allocation37_spill]] }
 0xb8d   : > { %s3414_s12 = smov %s2425_s13  ;;  %s3416_s14 = smov %s2437_s16 }
 0xb8e   : > { %s3417_s15 = smov %s2441_s17  ;;  %36 = sbr.rel (!%p3227_p10) target bundleno = 23 (0x17), region = 186 }
 0xb91   : > { %s3415_s13 = smov %s3411_s21 }
 0xb92   : > { %s3418_s16 = smov %s3412_s19  ;;  %s3419_s17 = smov %s3413_s26 }
 0xb95   :  { %1441 = vsyncpa [#allocation4], 1 }
 0xb96   :  { %1443 = vsyncpa [#allocation4 + $0x1], 1 }
 0xb97   :  { %1444 = vsyncpa [#allocation7], 1 }
 0xb98   :  { %1446 = vsyncpa [#allocation7 + $0x1], 1 }
 0xb99   :  { %1447 = vsyncpa [#allocation10], 1 }
 0xb9a   :  { %1449 = vsyncpa [#allocation10 + $0x1], 1 }
 0xb9b   :  { %1450 = vsyncpa [#allocation13], 1 }
 0xb9c   :  { %1452 = vsyncpa [#allocation13 + $0x1], 1 }
 0xb9d   :  { %1453 = vsyncpa [#allocation5], 1 }
 0xb9e   :  { %1455 = vsyncpa [#allocation5 + $0x1], 1 }
 0xb9f   :  { %1456 = vsyncpa [#allocation17], 1 }
 0xba0   :  { %1458 = vsyncpa [#allocation17 + $0x1], 1 }

</bundles_post_ra>
